<compile_context>
chip_gen: v5e
topology: v5e:2x2
jax: 0.10.0
libtpu: 0.0.40
codegen_flags: <defaults>
</compile_context>

<pallas_src>
import functools

import jax
import jax.numpy as jnp
from jax import lax
from jax.experimental import pallas as pl
from jax.experimental.pallas import tpu as pltpu

_SUBLANE = 8


def _cdiv(a, b):
    return -(-a // b)


def _round_up(a, b):
    return ((a + b - 1) // b) * b


def _gelu(x, approximate):
    if approximate:
        # tanh approximation -> EUP slot (frees VALU bandwidth), small numeric
        # deviation from PyTorch's default erf GELU.
        return jax.nn.gelu(x, approximate=True)
    # nn.GELU default: 0.5 * x * (1 + erf(x / sqrt(2)))
    inv_sqrt2 = jnp.asarray(0.7071067811865476, x.dtype)
    return 0.5 * x * (1.0 + lax.erf(x * inv_sqrt2))


def mlp_me_kernel(x_ref, w1_ref, b1_ref, w2_ref, b2_ref, o_ref, *, approximate):
    # x_ref  : (TN, C_in)    tile of point features (streamed)
    # w1_ref : (C_in, H)     first linear weight, BN1 scale pre-folded (resident)
    # b1_ref : (1, H)        folded BN1 shift = beta - mean * scale   (f32)
    # w2_ref : (H, C_out)    second linear weight, BN2 scale pre-folded (resident)
    # b2_ref : (1, C_out)    folded BN2 shift                          (f32)
    # o_ref  : (TN, C_out)
    x = x_ref[...]

    h = jnp.dot(x, w1_ref[...], preferred_element_type=jnp.float32)
    h = _gelu(h + b1_ref[...], approximate)
    h = h.astype(w2_ref.dtype)

    y = jnp.dot(h, w2_ref[...], preferred_element_type=jnp.float32)
    y = _gelu(y + b2_ref[...], approximate)

    o_ref[...] = y.astype(o_ref.dtype)


def prepare_mlp_me_params(w1, bn1, w2, bn2, *, eps=1e-5,
                          compute_dtype=jnp.float32):
    """One-time (model load) fold of eval-mode BatchNorm into the Linears.

    w1 : [H, C_in]    first Linear weight (PyTorch layout, bias=False)
    w2 : [C_out, H]   second Linear weight (PyTorch layout, bias=False)
    bn1/bn2 : dicts with gamma, beta, running_mean, running_var.

    compute_dtype=jnp.bfloat16 is the recommended deployment setting
    (halves HBM streaming; accumulation stays f32 inside the kernel).
    """
    def fold(bn):
        scale = bn["gamma"] / jnp.sqrt(bn["running_var"] + eps)
        shift = bn["beta"] - bn["running_mean"] * scale
        return scale.astype(jnp.float32), shift.astype(jnp.float32)

    s1, b1 = fold(bn1)
    s2, b2 = fold(bn2)

    # (x @ W^T) * s == x @ (W^T * s) exactly, since bias=False.
    w1f = (jnp.transpose(w1).astype(jnp.float32) * s1[None, :]).astype(compute_dtype)
    w2f = (jnp.transpose(w2).astype(jnp.float32) * s2[None, :]).astype(compute_dtype)

    return dict(w1=w1f, b1=b1.reshape(1, -1), w2=w2f, b2=b2.reshape(1, -1))


def _vmem_footprint(tile_n, c_in, hidden, c_out, itemsize):
    io = 2 * tile_n * (c_in + c_out) * itemsize            # double-buffered x / out tiles
    weights = (c_in * hidden + hidden * c_out) * itemsize  # Buffered(1) resident weights
    shifts = (hidden + c_out) * 4
    inter = tile_n * (hidden + c_out) * 4                  # f32 accumulators / GELU temps
    return io + weights + shifts + inter


def _pick_tile_n(N, c_in, hidden, c_out, itemsize, vmem_budget):
    # Target >= ~4 MB of streamed activation bytes per grid step so the
    # ~0.35 us/step pipeline overhead is amortized.
    target = 4 << 20
    tile = _round_up(max(target // max(1, (c_in + c_out) * itemsize), _SUBLANE),
                     _SUBLANE)
    tile = min(tile, 8192)
    while tile > _SUBLANE and _vmem_footprint(tile, c_in, hidden, c_out,
                                              itemsize) > vmem_budget:
        tile = max(_SUBLANE, _round_up(tile // 2, _SUBLANE))
    tile = min(tile, _round_up(N, _SUBLANE))
    # v7x megacore: the row axis is "parallel"; keep >=2 grid steps so both
    # TensorCores get work (no effect on single-TC v5e/v6e).
    while tile > _SUBLANE and _cdiv(N, tile) < 2:
        tile = max(_SUBLANE, _round_up(tile // 2, _SUBLANE))
    return max(tile, _SUBLANE)


def mlp_me_forward(x, params, *, tile_n=None, approximate_gelu=False,
                   out_dtype=None, vmem_budget_bytes=48 << 20):
    """Eval-mode MLP_ME forward on the feature matrix x: [N, C_in]."""
    w1, b1, w2, b2 = params["w1"], params["b1"], params["w2"], params["b2"]
    N, c_in = x.shape
    assert w1.shape[0] == c_in, (w1.shape, x.shape)
    hidden = w1.shape[1]
    c_out = w2.shape[1]
    out_dtype = x.dtype if out_dtype is None else out_dtype

    dt = w1.dtype
    if x.dtype != dt:
        x = x.astype(dt)  # no-op when the caller already streams compute_dtype
    itemsize = jnp.dtype(dt).itemsize

    if tile_n is None:
        tile_n = _pick_tile_n(N, c_in, hidden, c_out, itemsize, vmem_budget_bytes)
    tile_n = max(_SUBLANE, _round_up(tile_n, _SUBLANE))

    grid = (_cdiv(N, tile_n),)

    est = _vmem_footprint(tile_n, c_in, hidden, c_out, itemsize)
    vmem_limit = int(max(32 << 20, min(int(1.5 * est), vmem_budget_bytes)))

    resident = dict(pipeline_mode=pl.Buffered(1))  # revisited every step; 1 buffer

    return pl.pallas_call(
        functools.partial(mlp_me_kernel, approximate=approximate_gelu),
        out_shape=jax.ShapeDtypeStruct((N, c_out), out_dtype),
        grid_spec=pl.GridSpec(
            grid=grid,
            in_specs=[
                pl.BlockSpec((tile_n, c_in), lambda i: (i, 0)),            # x (streamed)
                pl.BlockSpec((c_in, hidden), lambda i: (0, 0), **resident),  # w1
                pl.BlockSpec((1, hidden), lambda i: (0, 0), **resident),     # bn1 shift
                pl.BlockSpec((hidden, c_out), lambda i: (0, 0), **resident),  # w2
                pl.BlockSpec((1, c_out), lambda i: (0, 0), **resident),       # bn2 shift
            ],
            out_specs=pl.BlockSpec((tile_n, c_out), lambda i: (i, 0)),
        ),
        compiler_params=pltpu.CompilerParams(
            dimension_semantics=("parallel",),
            vmem_limit_bytes=vmem_limit,
        ),
    )(x, w1, b1, w2, b2)


def mlp_me_reference(x, w1, bn1, w2, bn2, eps=1e-5):
    def bn_apply(h, bn):
        scale = bn["gamma"] / jnp.sqrt(bn["running_var"] + eps)
        shift = bn["beta"] - bn["running_mean"] * scale
        return h * scale[None, :] + shift[None, :]

    h = x @ w1.T
    h = _gelu(bn_apply(h, bn1), approximate=False)
    y = h @ w2.T
    y = _gelu(bn_apply(y, bn2), approximate=False)
    return y


if __name__ == "__main__":
    # Small, ragged point count with in=32, hidden=64, out=32 channels.
    N, in_features, hidden_features, out_features = 300, 32, 64, 32

    key = jax.random.PRNGKey(0)
    kx, kw1, kw2, kb = jax.random.split(key, 4)

    x = jax.random.normal(kx, (N, in_features), dtype=jnp.float32)

    # Linear weights (bias=False), deterministic synthetic init.
    w1 = jax.random.normal(kw1, (hidden_features, in_features), jnp.float32) * 0.1
    w2 = jax.random.normal(kw2, (out_features, hidden_features), jnp.float32) * 0.1

    # MinkowskiBatchNorm init per module: weight=1, bias=0; non-trivial running
    # stats to exercise the BN fold.
    bn_keys = jax.random.split(kb, 4)
    bn1 = dict(
        gamma=jnp.ones((hidden_features,), jnp.float32),
        beta=jnp.zeros((hidden_features,), jnp.float32),
        running_mean=0.05 * jax.random.normal(bn_keys[0], (hidden_features,), jnp.float32),
        running_var=1.0 + 0.1 * jax.random.uniform(bn_keys[1], (hidden_features,), jnp.float32))
    bn2 = dict(
        gamma=jnp.ones((out_features,), jnp.float32),
        beta=jnp.zeros((out_features,), jnp.float32),
        running_mean=0.05 * jax.random.normal(bn_keys[2], (out_features,), jnp.float32),
        running_var=1.0 + 0.1 * jax.random.uniform(bn_keys[3], (out_features,), jnp.float32))

    ref = mlp_me_reference(x, w1, bn1, w2, bn2)

    # Exact (f32 / erf) path — matches PyTorch eval semantics.
    params_f32 = prepare_mlp_me_params(w1, bn1, w2, bn2)
    out = jax.block_until_ready(mlp_me_forward(x, params_f32))
    assert out.shape == (N, out_features)
    assert jnp.allclose(out, ref, atol=1e-5, rtol=1e-5)

    # Deployment config: bf16 streaming + bf16 writeback (f32 accumulation
    # inside the kernel).  Recommended on v6e/v7x; pair with
    # approximate_gelu=True on v5e/v7x if the tolerance allows.
    params_bf16 = prepare_mlp_me_params(w1, bn1, w2, bn2,
                                        compute_dtype=jnp.bfloat16)
    out_bf16 = jax.block_until_ready(
        mlp_me_forward(x.astype(jnp.bfloat16), params_bf16))
    assert out_bf16.shape == (N, out_features)
    assert out_bf16.dtype == jnp.bfloat16
    assert jnp.allclose(out_bf16.astype(jnp.float32), ref, atol=5e-2, rtol=5e-2)

    print("KERNEL_OK")
</pallas_src>

<mosaic_0001>
module attributes {stable_mosaic.version = 11 : i64} {
  func.func @mlp_me_kernel(%arg0: i32, %arg1: memref<152x32xf32, #tpu.memory_space<vmem>>, %arg2: memref<32x64xf32, #tpu.memory_space<vmem>>, %arg3: memref<1x64xf32, #tpu.memory_space<vmem>>, %arg4: memref<64x32xf32, #tpu.memory_space<vmem>>, %arg5: memref<1x32xf32, #tpu.memory_space<vmem>>, %arg6: memref<152x32xf32, #tpu.memory_space<vmem>>) attributes {dimension_semantics = [#tpu.dimension_semantics<parallel>], iteration_bounds = array<i64: 2>, scalar_prefetch = 0 : i64, scratch_operands = 0 : i64, tpu.core_type = #tpu.core_type<tc>, window_params = [{transform_indices = @transform_0, window_bounds = array<i64: 152, 32>}, {pipeline_mode = #tpu.pipeline_mode<synchronous>, transform_indices = @transform_1, window_bounds = array<i64: 32, 64>}, {pipeline_mode = #tpu.pipeline_mode<synchronous>, transform_indices = @transform_2, window_bounds = array<i64: 1, 64>}, {pipeline_mode = #tpu.pipeline_mode<synchronous>, transform_indices = @transform_3, window_bounds = array<i64: 64, 32>}, {pipeline_mode = #tpu.pipeline_mode<synchronous>, transform_indices = @transform_4, window_bounds = array<i64: 1, 32>}, {transform_indices = @transform_5, window_bounds = array<i64: 152, 32>}]} {
    %c0 = arith.constant 0 : index
    %c0_0 = arith.constant 0 : index
    %0 = vector.load %arg1[%c0, %c0_0] : memref<152x32xf32, #tpu.memory_space<vmem>>, vector<152x32xf32>
    %c0_1 = arith.constant 0 : index
    %c0_2 = arith.constant 0 : index
    %1 = vector.load %arg2[%c0_1, %c0_2] : memref<32x64xf32, #tpu.memory_space<vmem>>, vector<32x64xf32>
    %cst = arith.constant dense<0.000000e+00> : vector<152x64xf32>
    %2 = tpu.matmul %0, %1, %cst {dimension_numbers = #tpu.dot_dimension_numbers<[1], [0], [0], [1], [0, 0, 1, 1], [], []>} : vector<152x32xf32>, vector<32x64xf32>, vector<152x64xf32> -> vector<152x64xf32>
    %c0_3 = arith.constant 0 : index
    %c0_4 = arith.constant 0 : index
    %3 = vector.load %arg3[%c0_3, %c0_4] : memref<1x64xf32, #tpu.memory_space<vmem>>, vector<1x64xf32>
    %4 = vector.broadcast %3 : vector<1x64xf32> to vector<152x64xf32>
    %5 = arith.addf %2, %4 : vector<152x64xf32>
    %cst_5 = arith.constant 5.000000e-01 : f32
    %6 = vector.broadcast %cst_5 : f32 to vector<152x64xf32>
    %7 = arith.mulf %6, %5 : vector<152x64xf32>
    %cst_6 = arith.constant 0.707106769 : f32
    %8 = vector.broadcast %cst_6 : f32 to vector<152x64xf32>
    %9 = arith.mulf %5, %8 : vector<152x64xf32>
    %10 = math.erf %9 : vector<152x64xf32>
    %cst_7 = arith.constant 1.000000e+00 : f32
    %11 = vector.broadcast %cst_7 : f32 to vector<152x64xf32>
    %12 = arith.addf %11, %10 : vector<152x64xf32>
    %13 = arith.mulf %7, %12 : vector<152x64xf32>
    %c0_8 = arith.constant 0 : index
    %c0_9 = arith.constant 0 : index
    %14 = vector.load %arg4[%c0_8, %c0_9] : memref<64x32xf32, #tpu.memory_space<vmem>>, vector<64x32xf32>
    %cst_10 = arith.constant dense<0.000000e+00> : vector<152x32xf32>
    %15 = tpu.matmul %13, %14, %cst_10 {dimension_numbers = #tpu.dot_dimension_numbers<[1], [0], [0], [1], [0, 0, 1, 1], [], []>} : vector<152x64xf32>, vector<64x32xf32>, vector<152x32xf32> -> vector<152x32xf32>
    %c0_11 = arith.constant 0 : index
    %c0_12 = arith.constant 0 : index
    %16 = vector.load %arg5[%c0_11, %c0_12] : memref<1x32xf32, #tpu.memory_space<vmem>>, vector<1x32xf32>
    %17 = vector.broadcast %16 : vector<1x32xf32> to vector<152x32xf32>
    %18 = arith.addf %15, %17 : vector<152x32xf32>
    %cst_13 = arith.constant 5.000000e-01 : f32
    %19 = vector.broadcast %cst_13 : f32 to vector<152x32xf32>
    %20 = arith.mulf %19, %18 : vector<152x32xf32>
    %cst_14 = arith.constant 0.707106769 : f32
    %21 = vector.broadcast %cst_14 : f32 to vector<152x32xf32>
    %22 = arith.mulf %18, %21 : vector<152x32xf32>
    %23 = math.erf %22 : vector<152x32xf32>
    %cst_15 = arith.constant 1.000000e+00 : f32
    %24 = vector.broadcast %cst_15 : f32 to vector<152x32xf32>
    %25 = arith.addf %24, %23 : vector<152x32xf32>
    %26 = arith.mulf %20, %25 : vector<152x32xf32>
    %c0_16 = arith.constant 0 : index
    %c0_17 = arith.constant 0 : index
    %27 = vector.load %arg6[%c0_16, %c0_17] : memref<152x32xf32, #tpu.memory_space<vmem>>, vector<152x32xf32>
    tpu.vector_store %arg6[%c0_16, %c0_17], %26 {strides = array<i32>} : memref<152x32xf32, #tpu.memory_space<vmem>>, vector<152x32xf32>,
    return
  }
  func.func @transform_0(%arg0: i32) -> (i32, i32) {
    %c0_i32 = arith.constant 0 : i32
    %c0_i32_0 = arith.constant 0 : i32
    return %arg0, %c0_i32 : i32, i32
  }
  func.func @transform_1(%arg0: i32) -> (i32, i32) {
    %c0_i32 = arith.constant 0 : i32
    %c0_i32_0 = arith.constant 0 : i32
    %c0_i32_1 = arith.constant 0 : i32
    return %c0_i32, %c0_i32_0 : i32, i32
  }
  func.func @transform_2(%arg0: i32) -> (i32, i32) {
    %c0_i32 = arith.constant 0 : i32
    %c0_i32_0 = arith.constant 0 : i32
    %c0_i32_1 = arith.constant 0 : i32
    return %c0_i32, %c0_i32_0 : i32, i32
  }
  func.func @transform_3(%arg0: i32) -> (i32, i32) {
    %c0_i32 = arith.constant 0 : i32
    %c0_i32_0 = arith.constant 0 : i32
    %c0_i32_1 = arith.constant 0 : i32
    return %c0_i32, %c0_i32_0 : i32, i32
  }
  func.func @transform_4(%arg0: i32) -> (i32, i32) {
    %c0_i32 = arith.constant 0 : i32
    %c0_i32_0 = arith.constant 0 : i32
    %c0_i32_1 = arith.constant 0 : i32
    return %c0_i32, %c0_i32_0 : i32, i32
  }
  func.func @transform_5(%arg0: i32) -> (i32, i32) {
    %c0_i32 = arith.constant 0 : i32
    %c0_i32_0 = arith.constant 0 : i32
    return %arg0, %c0_i32 : i32, i32
  }
}

</mosaic_0001>

<bundles_post_ra>
// kernel: tpu_custom_call.1
= control target key start
LH: loop header
LB: loop body
LE: loop exit
PB: predicated region body
PF: predicated region fallthrough
CT: control target
= control target key end

     0   :  { %s2509_s18 = smov 0   ;;  %s4195_s0 = inlined_call_operand.vmem [shape: f32[300,32], index: 0, kind: input, shape index: {}]   ;;  %s4196_s1 = inlined_call_operand.vmem [shape: f32[32,64], index: 1, kind: input, shape index: {}]   ;;  %s4197_s2 = inlined_call_operand.vmem [shape: f32[1,64], index: 2, kind: input, shape index: {}]   ;;  %s4198_s3 = inlined_call_operand.vmem [shape: f32[64,32], index: 3, kind: input, shape index: {}]   ;;  %s4199_s4 = inlined_call_operand.vmem [shape: f32[1,32], index: 4, kind: input, shape index: {}]   ;;  %s4200_s5 = inlined_call_operand.vmem [shape: f32[300,32], index: 5, kind: output, shape index: {}]  }
   0x1 LB: > { %s2278_s19 = sadd.s32 4294967295, %s2477_s18   ;;  %p2282_p0 = scmp.ge.s32.totalorder %s2477_s18, 1  ;;  %s2477_s18 = sphi %s2509_s18, %s15_s18  }
   0x2   : > { %p188_p1 = scmp.lt.s32.totalorder %s2477_s18, 3 }
   0x4   : > { %p189_p2 = pnand %p2282_p0, %p188_p1 }
   0x6   : > { %192 = sbr.rel (%p189_p2) target bundleno = 615 (0x267), region = 40 }
   0xb   : > { %v250_v0 = vld [vmem:[%s4196_s1 + $0x18] sm:$0xff]  ;;  %v249_v1 = vld [vmem:[%s4196_s1 + $0x10] sm:$0xff]  ;;  %s216_s24 = smul.u32 19, %s2278_s19  ;;  %v248_v2 = vld [vmem:[%s4196_s1 + $0x8] sm:$0xff]  ;;  %vm255_vm0 = vcmask 261120   ;;  %vm1235_vm15 = vcmask 523264  }
   0xc   : > { %325 = vmatpush.msra.mxu0 %v250_v0  ;;  %2363 = vmatpush.msra.mxu3 %v250_v0  ;;  %v247_v3 = vld [vmem:[%s4196_s1] sm:$0xff]  ;;  %v1230_v39 = vld [vmem:[%s4198_s3 + $0x38] sm:$0xff] }
   0xd   : > { %p217_p3 = scmp.lt.s32.totalorder %s216_s24, 37  ;;  %v2580_v23 = vld [vmem:[%s4197_s2] ss:$0 sm:$0xff]  ;;  %1301 = vmatpush.msra.mxu1 %v1230_v39  ;;  %2367 = vmatpush.msra.mxu2 %v1230_v39 }
   0xe   : > { %326 = vmatpush.msra.mxu0 %v249_v1  ;;  %2364 = vmatpush.msra.mxu3 %v249_v1  ;;  %v1229_v1 = vld [vmem:[%s4198_s3 + $0x30] sm:$0xff] }
   0xf   : > { %s4326_s24 = smov (!%p217_p3, %s216_s24), 37  ;;  %1302 = vmatpush.msra.mxu1 %v1229_v1  ;;  %2369 = vmatpush.msra.mxu2 %v1229_v1 }
  0x10   : > { %327 = vmatpush.msra.mxu0 %v248_v2  ;;  %2365 = vmatpush.msra.mxu3 %v248_v2  ;;  %s2283_s29 = sshll.u32 %s4326_s24, 3 }
  0x11   : > { %s2537_s7 = scalar_lea.vmem %s4195_s0, %s2283_s29  ;;  %s3625_s10 = scalar_lea.vmem %s4200_s5, %s2283_s29 }
  0x12   : > { %328 = vmatpush.msra.mxu0 %v247_v3  ;;  %2366 = vmatpush.msra.mxu3 %v247_v3  ;;  %v228_v4 = vld [vmem:[%s2537_s7] sm:$0xff]  ;;  %v238_v5 = vld [vmem:[%s2537_s7 + $0x50] sm:$0xff]  ;;  %v229_v6 = vld [vmem:[%s2537_s7 + $0x8] sm:$0xff] }
  0x13   : > { %2285 = vmatmul.msk.f32.vlgmr.msra.gmra.mxu0 %vm255_vm0, %v228_v4  ;;  %2295 = vmatmul.msk.f32.vlgmr.msra.gmra.mxu3 %vm255_vm0, %v238_v5  ;;  %v239_v7 = vld [vmem:[%s2537_s7 + $0x58] sm:$0xff]  ;;  %v230_v8 = vld [vmem:[%s2537_s7 + $0x10] sm:$0xff]  ;;  %v240_v9 = vld [vmem:[%s2537_s7 + $0x60] sm:$0xff] }
  0x14   : > { %v231_v10 = vld [vmem:[%s2537_s7 + $0x18] sm:$0xff]  ;;  %v241_v11 = vld [vmem:[%s2537_s7 + $0x68] sm:$0xff]  ;;  %v232_v12 = vld [vmem:[%s2537_s7 + $0x20] sm:$0xff]  ;;  %2368 = vmatpush.msrb.mxu3 %v1230_v39 }
  0x15   : > { %v242_v13 = vld [vmem:[%s2537_s7 + $0x70] sm:$0xff]  ;;  %v233_v14 = vld [vmem:[%s2537_s7 + $0x28] sm:$0xff]  ;;  %v243_v15 = vld [vmem:[%s2537_s7 + $0x78] sm:$0xff] }
  0x16   : > { %v234_v16 = vld [vmem:[%s2537_s7 + $0x30] sm:$0xff]  ;;  %v244_v17 = vld [vmem:[%s2537_s7 + $0x80] sm:$0xff]  ;;  %v235_v18 = vld [vmem:[%s2537_s7 + $0x38] sm:$0xff]  ;;  %2370 = vmatpush.msrb.mxu3 %v1229_v1 }
  0x17   : > { %v245_v19 = vld [vmem:[%s2537_s7 + $0x88] sm:$0xff]  ;;  %v236_v20 = vld [vmem:[%s2537_s7 + $0x40] sm:$0xff]  ;;  %v246_v21 = vld [vmem:[%s2537_s7 + $0x90] sm:$0xff] }
  0x18   : > { %v237_v22 = vld [vmem:[%s2537_s7 + $0x48] sm:$0xff] }
  0x1b   : > { %2286 = vmatmul.msk.f32.gmra.mxu0 %vm255_vm0, %v229_v6  ;;  %2296 = vmatmul.msk.f32.gmra.mxu3 %vm255_vm0, %v239_v7  ;;  %v1228_v6 = vld [vmem:[%s4198_s3 + $0x28] sm:$0xff] }
  0x1c   : > { %1303 = vmatpush.msra.mxu1 %v1228_v6  ;;  %2372 = vmatpush.msrb.mxu3 %v1228_v6 }
  0x1d   : > { %2371 = vmatpush.msra.mxu2 %v1228_v6 }
  0x23   : > { %2287 = vmatmul.msk.f32.gmra.mxu0 %vm255_vm0, %v230_v8  ;;  %2297 = vmatmul.msk.f32.gmra.mxu3 %vm255_vm0, %v240_v9 }
  0x2b   : > { %2288 = vmatmul.msk.f32.gmra.mxu0 %vm255_vm0, %v231_v10  ;;  %2298 = vmatmul.msk.f32.gmra.mxu3 %vm255_vm0, %v241_v11 }
  0x33   : > { %2289 = vmatmul.msk.f32.gmra.mxu0 %vm255_vm0, %v232_v12  ;;  %2299 = vmatmul.msk.f32.gmra.mxu3 %vm255_vm0, %v242_v13 }
  0x3b   : > { %2290 = vmatmul.msk.f32.gmra.mxu0 %vm255_vm0, %v233_v14  ;;  %2300 = vmatmul.msk.f32.gmra.mxu3 %vm255_vm0, %v243_v15  ;;  %v1227_v14 = vld [vmem:[%s4198_s3 + $0x20] sm:$0xff] }
  0x3c   : > { %1304 = vmatpush.msra.mxu1 %v1227_v14  ;;  %2374 = vmatpush.msrb.mxu3 %v1227_v14 }
  0x3d   : > { %2373 = vmatpush.msra.mxu2 %v1227_v14  ;;  %v1223_v14 = vld [vmem:[%s4198_s3] sm:$0xff] }
  0x43   : > { %2291 = vmatmul.msk.f32.gmra.mxu0 %vm255_vm0, %v234_v16  ;;  %2301 = vmatmul.msk.f32.gmra.mxu3 %vm255_vm0, %v244_v17  ;;  %v1226_v17 = vld [vmem:[%s4198_s3 + $0x18] sm:$0xff] }
  0x44   : > { %1305 = vmatpush.msra.mxu1 %v1226_v17  ;;  %2376 = vmatpush.msrb.mxu3 %v1226_v17 }
  0x45   : > { %2375 = vmatpush.msra.mxu2 %v1226_v17 }
  0x4b   : > { %2292 = vmatmul.msk.f32.gmra.mxu0 %vm255_vm0, %v235_v18  ;;  %2302 = vmatmul.msk.f32.gmra.mxu3 %vm255_vm0, %v245_v19 }
  0x53   : > { %2293 = vmatmul.msk.f32.gmra.mxu0 %vm255_vm0, %v236_v20  ;;  %2303 = vmatmul.msk.f32.gmra.mxu3 %vm255_vm0, %v246_v21 }
  0x5b   : > { %2294 = vmatmul.msk.f32.gmra.mxu0 %vm255_vm0, %v237_v22 }
  0x90   : > { %v330_v24 = vpop.f32.mrf.mxu0 }
  0x91   : > { %v2583_v25 = vadd.f32 %v2580_v23, %v330_v24 }
  0x93   : > { %v2586_v26 = vmul.f32 0.70710677, %v2583_v25 }
  0x95   : > { %v425_v28 = vmul.f32 %v2586_v26, %v2586_v26 }
  0x96   : > { %v360_v29 = vpop.f32.mrf.mxu3 }
  0x97   : > { %v2591_v30 = vadd.f32 %v2580_v23, %v360_v29  ;;  %v2596_v32 = vmin.f32 %v425_v28, 16.0 }
  0x98   : > { %v333_v27 = vpop.f32.mrf.mxu0 }
  0x99   : > { %4222 = vst [vmem:[#allocation2_spill] sm:$0xff] %v2591_v30  ;;  %v2594_v31 = vadd.f32 %v2580_v23, %v333_v27  ;;  %v2599_v33 = vmul.f32 0.70710677, %v2591_v30  ;;  %v438_v35 = vmul.f32 3.8918573e-05, %v2596_v32 }
  0x9a   : > { %v427_v47 = vmul.f32 2.1237322e-06, %v2596_v32 }
  0x9b   : > { %v2602_v34 = vmul.f32 0.70710677, %v2594_v31  ;;  %v825_v36 = vmul.f32 %v2599_v33, %v2599_v33  ;;  %v439_v38 = vadd.f32 0.001143296, %v438_v35 }
  0x9c   : > { %v428_v54 = vadd.f32 0.00028619796, %v427_v47 }
  0x9d   : > { %v465_v37 = vmul.f32 %v2602_v34, %v2602_v34  ;;  %v2612_v40 = vmin.f32 %v825_v36, 16.0  ;;  %v440_v42 = vmul.f32 %v439_v38, %v2596_v32 }
  0x9e   : > { %v363_v50 = vpop.f32.mrf.mxu3  ;;  %v429_v61 = vmul.f32 %v428_v54, %v2596_v32 }
  0x9f   : > { %v2614_v41 = vmin.f32 %v465_v37, 16.0  ;;  %v838_v44 = vmul.f32 3.8918573e-05, %v2612_v40  ;;  %v441_v48 = vadd.f32 0.014752088, %v440_v42  ;;  %v2624_v52 = vadd.f32 %v2580_v23, %v363_v50 }
  0xa0   : > { %v336_v43 = vpop.f32.mrf.mxu0  ;;  %v827_v56 = vmul.f32 2.1237322e-06, %v2612_v40  ;;  %v430_v7 = vadd.f32 0.0036580483, %v429_v61 }
  0xa1   : > { %v478_v45 = vmul.f32 3.8918573e-05, %v2614_v41  ;;  %v2620_v46 = vadd.f32 %v2580_v23, %v336_v43  ;;  %v839_v49 = vadd.f32 0.001143296, %v838_v44  ;;  %4223 = vst [vmem:[#allocation3_spill] sm:$0xff] %v2624_v52  ;;  %v442_v55 = vmul.f32 %v441_v48, %v2596_v32 }
  0xa2   : > { %v2634_v59 = vmul.f32 0.70710677, %v2624_v52  ;;  %v828_v63 = vadd.f32 0.00028619796, %v827_v56  ;;  %v467_v2 = vmul.f32 2.1237322e-06, %v2614_v41  ;;  %v431_v18 = vmul.f32 %v430_v7, %v2596_v32 }
  0xa3   : > { %v479_v51 = vadd.f32 0.001143296, %v478_v45  ;;  %v2627_v53 = vmul.f32 0.70710677, %v2620_v46  ;;  %v840_v57 = vmul.f32 %v839_v49, %v2612_v40  ;;  %v443_v62 = vadd.f32 0.112945676, %v442_v55 }
  0xa4   : > { %v865_v4 = vmul.f32 %v2634_v59, %v2634_v59  ;;  %v829_v9 = vmul.f32 %v828_v63, %v2612_v40  ;;  %v468_v11 = vadd.f32 0.00028619796, %v467_v2  ;;  %v432_v35 = vadd.f32 0.05243302, %v431_v18  ;;  %v1225_v63 = vld [vmem:[%s4198_s3 + $0x10] sm:$0xff]  ;;  %v1224_v7 = vld [vmem:[%s4198_s3 + $0x8] sm:$0xff] }
  0xa5   : > { %v480_v58 = vmul.f32 %v479_v51, %v2614_v41  ;;  %v505_v60 = vmul.f32 %v2627_v53, %v2627_v53  ;;  %v841_v0 = vadd.f32 0.014752088, %v840_v57  ;;  %v444_v8 = vmul.f32 %v443_v62, %v2596_v32  ;;  %1306 = vmatpush.msra.mxu1 %v1225_v63  ;;  %2378 = vmatpush.msrb.mxu3 %v1225_v63 }
  0xa6   : > { %v2654_v13 = vmin.f32 %v865_v4, 16.0  ;;  %v830_v20 = vadd.f32 0.0036580483, %v829_v9  ;;  %v469_v22 = vmul.f32 %v468_v11, %v2614_v41  ;;  %v366_v29 = vpop.f32.mrf.mxu3  ;;  %v433_v48 = vmul.f32 %v432_v35, %v2596_v32  ;;  %2377 = vmatpush.msra.mxu2 %v1225_v63 }
  0xa7   : > { %v481_v3 = vadd.f32 0.014752088, %v480_v58  ;;  %v2645_v5 = vmin.f32 %v505_v60, 16.0  ;;  %v842_v10 = vmul.f32 %v841_v0, %v2612_v40  ;;  %v445_v19 = vadd.f32 0.4994258, %v444_v8  ;;  %1307 = vmatpush.msra.mxu1 %v1224_v7  ;;  %2380 = vmatpush.msrb.mxu3 %v1224_v7 }
  0xa8   : > { %v339_v16 = vpop.f32.mrf.mxu0  ;;  %v878_v27 = vmul.f32 3.8918573e-05, %v2654_v13  ;;  %v2668_v37 = vadd.f32 %v2580_v23, %v366_v29  ;;  %v831_v38 = vmul.f32 %v830_v20, %v2612_v40  ;;  %v470_v42 = vadd.f32 0.0036580483, %v469_v22  ;;  %2379 = vmatpush.msra.mxu2 %v1224_v7 }
  0xa9   : > { %v482_v12 = vmul.f32 %v481_v3, %v2614_v41  ;;  %v518_v15 = vmul.f32 3.8918573e-05, %v2645_v5  ;;  %v843_v21 = vadd.f32 0.112945676, %v842_v10  ;;  %v446_v36 = vmul.f32 %v445_v19, %v2596_v32  ;;  %1308 = vmatpush.msra.mxu1 %v1223_v14  ;;  %2382 = vmatpush.msrb.mxu3 %v1223_v14 }
  0xaa   : > { %4224 = vst [vmem:[#allocation4_spill] sm:$0xff] %v2668_v37  ;;  %v867_v44 = vmul.f32 2.1237322e-06, %v2654_v13  ;;  %v879_v45 = vadd.f32 0.001143296, %v878_v27  ;;  %v2682_v55 = vadd.f32 %v2580_v23, %v339_v16  ;;  %v471_v57 = vmul.f32 %v470_v42, %v2614_v41  ;;  %2381 = vmatpush.msra.mxu2 %v1223_v14 }
  0xab   : > { %v483_v24 = vadd.f32 0.112945676, %v482_v12  ;;  %v519_v28 = vadd.f32 0.001143296, %v518_v15  ;;  %v844_v39 = vmul.f32 %v843_v21, %v2612_v40  ;;  %v2676_v49 = vadd.f32 1.0, %v446_v36 }
  0xac   : > { %v2679_v50 = vmul.f32 0.70710677, %v2668_v37  ;;  %v832_v51 = vadd.f32 0.05243302, %v831_v38  ;;  %v868_v60 = vadd.f32 0.00028619796, %v867_v44  ;;  %v880_v61 = vmul.f32 %v879_v45, %v2654_v13 }
  0xad   : > { %v484_v43 = vmul.f32 %v483_v24, %v2614_v41  ;;  %v520_v47 = vmul.f32 %v519_v28, %v2645_v5  ;;  %v845_v54 = vadd.f32 0.4994258, %v844_v39  ;;  %v434_v0 = vadd.f32 0.18741608, %v433_v48 }
  0xae   : > { %4225 = vst [vmem:[#allocation5_spill] sm:$0xff] %v2679_v50  ;;  %2393 = vrcp.f32 %v2676_v49  ;;  %v905_v1 = vmul.f32 %v2679_v50, %v2679_v50  ;;  %v833_v3 = vmul.f32 %v832_v51, %v2612_v40  ;;  %v2698_v6 = vmul.f32 0.70710677, %v2682_v55 }
  0xaf   : > { %v485_v58 = vadd.f32 0.4994258, %v484_v43  ;;  %v521_v62 = vadd.f32 0.014752088, %v520_v47  ;;  %v846_v4 = vmul.f32 %v845_v54, %v2612_v40  ;;  %v472_v8 = vadd.f32 0.05243302, %v471_v57 }
  0xb0   : > { %v342_v56 = vpop.f32.mrf.mxu0  ;;  %v869_v10 = vmul.f32 %v868_v60, %v2654_v13  ;;  %v881_v11 = vadd.f32 0.014752088, %v880_v61  ;;  %v435_v15 = vmul.f32 %v434_v0, %v2596_v32  ;;  %v2710_v16 = vmin.f32 %v905_v1, 16.0 }
  0xb1   : > { %v2693_v2 = vadd.f32 %v2580_v23, %v342_v56  ;;  %v486_v9 = vmul.f32 %v485_v58, %v2614_v41  ;;  %v522_v12 = vmul.f32 %v521_v62, %v2645_v5  ;;  %v834_v18 = vadd.f32 0.18741608, %v833_v3 }
  0xb2   : > { %v2715_v19 = vadd.f32 1.0, %v846_v4  ;;  %v545_v20 = vmul.f32 %v2698_v6, %v2698_v6  ;;  %v473_v22 = vmul.f32 %v472_v8, %v2614_v41  ;;  %v870_v32 = vadd.f32 0.0036580483, %v869_v10 }
  0xb3   : > { %v2713_v17 = vmul.f32 0.70710677, %v2693_v2  ;;  %v2722_v24 = vadd.f32 1.0, %v486_v9  ;;  %v882_v27 = vmul.f32 %v881_v11, %v2654_v13  ;;  %v507_v28 = vmul.f32 2.1237322e-06, %v2645_v5 }
  0xb4   : > { %v2719_v21 = vpop.eup %2393  ;;  %v523_v29 = vadd.f32 0.112945676, %v522_v12  ;;  %v436_v35 = vadd.f32 1.1283791, %v435_v15  ;;  %v918_v36 = vmul.f32 3.8918573e-05, %v2710_v16  ;;  %v835_v42 = vmul.f32 %v834_v18, %v2612_v40 }
  0xb5   : > { %v585_v38 = vmul.f32 %v2713_v17, %v2713_v17  ;;  %v449_v39 = vmul.f32 %v2719_v21, %v2676_v49  ;;  %2395 = vrcp.f32 %v2715_v19  ;;  %v2733_v43 = vmin.f32 %v545_v20, 16.0 }
  0xb6   : > { %v474_v44 = vadd.f32 0.18741608, %v473_v22  ;;  %2397 = vrcp.f32 %v2722_v24  ;;  %v871_v45 = vmul.f32 %v870_v32, %v2654_v13  ;;  %v883_v47 = vadd.f32 0.112945676, %v882_v27 }
  0xb7   : > { %v459_v48 = vand.u32 2147483648, %v2676_v49  ;;  %v508_v51 = vadd.f32 0.00028619796, %v507_v28  ;;  %v524_v54 = vmul.f32 %v523_v29, %v2645_v5  ;;  %v2740_v56 = vmul.f32 0.5, %v2583_v25 }
  0xb8   : > { %v2743_v40 = vmul.f32 0.5, %v2594_v31  ;;  %v919_v57 = vadd.f32 0.001143296, %v918_v36  ;;  %v2745_v58 = vmin.f32 %v585_v38, 16.0  ;;  %v345_v60 = vpop.f32.mrf.mxu0  ;;  %v450_v61 = vsub.f32 1.0, %v449_v39  ;;  %v369_v39 = vpop.f32.mrf.mxu3 }
  0xb9   : > { %v836_v62 = vadd.f32 1.1283791, %v835_v42  ;;  %v2748_v63 = vmul.f32 0.5, %v2620_v46  ;;  %v558_v0 = vmul.f32 3.8918573e-05, %v2733_v43  ;;  %v2752_v1 = vmul.f32 %v436_v35, %v2586_v26 }
  0xba   : > { %v475_v25 = vmul.f32 %v474_v44, %v2614_v41  ;;  %v872_v3 = vadd.f32 0.05243302, %v871_v45  ;;  %v884_v31 = vmul.f32 %v883_v47, %v2654_v13  ;;  %vm453_vm1 = vweird.f32 %v2676_v49 }
  0xbb   : > { %v2756_v4 = vpop.eup %2395  ;;  %v457_v7 = vand.u32 2147483647, %v2676_v49  ;;  %v2760_v8 = vor.u32 1.1754944e-38, %v459_v48  ;;  %v509_v46 = vmul.f32 %v508_v51, %v2645_v5  ;;  %v525_v9 = vadd.f32 0.4994258, %v524_v54 }
  0xbc   : > { %v2763_v10 = vpop.eup %2397  ;;  %vm454_vm2 = vweird.f32 %v2719_v21  ;;  %v920_v26 = vmul.f32 %v919_v57, %v2710_v16  ;;  %v598_v41 = vmul.f32 3.8918573e-05, %v2745_v58  ;;  %v2769_v11 = vadd.f32 %v2580_v23, %v345_v60 }
  0xbd   : > { %v451_v12 = vmul.f32 %v2719_v21, %v450_v61  ;;  %v2773_v14 = vmul.f32 %v836_v62, %v2599_v33  ;;  %v859_v15 = vand.u32 2147483648, %v2715_v19  ;;  %v559_v18 = vadd.f32 0.001143296, %v558_v0  ;;  %vm2810_vm5 = vmor %vm453_vm1, %vm454_vm2 }
  0xbe   : > { %v849_v20 = vmul.f32 %v2756_v4, %v2715_v19  ;;  %v476_v22 = vadd.f32 1.1283791, %v475_v25  ;;  %v873_v32 = vmul.f32 %v872_v3, %v2654_v13  ;;  %v885_v27 = vadd.f32 0.4994258, %v884_v31 }
  0xbf   : > { %v857_v28 = vand.u32 2147483647, %v2715_v19  ;;  %v489_v29 = vmul.f32 %v2763_v10, %v2722_v24  ;;  %v510_v35 = vadd.f32 0.0036580483, %v509_v46  ;;  %v526_v36 = vmul.f32 %v525_v9, %v2645_v5 }
  0xc0   : > { %vm2783_vm3 = vcmp.eq.f32.partialorder %v457_v7, 8.507059e+37  ;;  %vm853_vm4 = vweird.f32 %v2715_v19  ;;  %v921_v38 = vadd.f32 0.014752088, %v920_v26  ;;  %v599_v42 = vadd.f32 0.001143296, %v598_v41  ;;  %v348_v62 = vpop.f32.mrf.mxu0 }
  0xc1   : > { %v2789_v44 = vmul.f32 0.70710677, %v2769_v11  ;;  %v452_v45 = vadd.f32 %v2719_v21, %v451_v12  ;;  %v2792_v47 = vor.u32 1.1754944e-38, %v859_v15  ;;  %v560_v48 = vmul.f32 %v559_v18, %v2733_v43 }
  0xc2   : > { %v2796_v51 = vadd.f32 %v2580_v23, %v369_v39  ;;  %v850_v54 = vsub.f32 1.0, %v849_v20  ;;  %v2799_v57 = vmul.f32 %v476_v22, %v2602_v34  ;;  %v874_v60 = vadd.f32 0.18741608, %v873_v32 }
  0xc3   : > { %v886_v61 = vmul.f32 %v885_v27, %v2654_v13  ;;  %v490_v0 = vsub.f32 1.0, %v489_v29  ;;  %v497_v25 = vand.u32 2147483647, %v2722_v24  ;;  %v511_v3 = vmul.f32 %v510_v35, %v2645_v5 }
  0xc4   : > { %4228 = vst [vmem:[#allocation6_spill] sm:$0xff] %v2796_v51  ;;  %v2804_v31 = vadd.f32 1.0, %v526_v36  ;;  %v499_v34 = vand.u32 2147483648, %v2722_v24  ;;  %v922_v46 = vmul.f32 %v921_v38, %v2710_v16  ;;  %v600_v9 = vmul.f32 %v599_v42, %v2745_v58 }
  0xc5   : > { %v625_v26 = vmul.f32 %v2789_v44, %v2789_v44  ;;  %v456_v41 = vsel %vm2810_vm5, %v2719_v21, %v452_v45  ;;  %vm493_vm6 = vweird.f32 %v2722_v24  ;;  %v561_v49 = vadd.f32 0.014752088, %v560_v48 }
  0xc6   : > { %v2824_v12 = vmul.f32 0.70710677, %v2796_v51  ;;  %v2827_v15 = vadd.f32 %v2580_v23, %v348_v62  ;;  %v851_v18 = vmul.f32 %v2756_v4, %v850_v54  ;;  %vm2830_vm7 = vcmp.eq.f32.partialorder %v857_v28, 8.507059e+37 }
  0xc7   : > { %v875_v22 = vmul.f32 %v874_v60, %v2654_v13  ;;  %v2835_v32 = vadd.f32 1.0, %v886_v61  ;;  %v547_v21 = vmul.f32 2.1237322e-06, %v2733_v43  ;;  %v491_v27 = vmul.f32 %v2763_v10, %v490_v0 }
  0xc8   : > { %4231 = vst [vmem:[#allocation7_spill] sm:$0xff] %v2824_v12  ;;  %v512_v29 = vadd.f32 0.05243302, %v511_v3  ;;  %2399 = vrcp.f32 %v2804_v31  ;;  %v907_v35 = vmul.f32 2.1237322e-06, %v2710_v16  ;;  %vm854_vm8 = vweird.f32 %v2756_v4 }
  0xc9   : > { %v923_v36 = vadd.f32 0.112945676, %v922_v46  ;;  %v601_v28 = vadd.f32 0.014752088, %v600_v9  ;;  %v2842_v38 = vmin.f32 %v625_v26, 16.0  ;;  %v461_v13 = vsel %vm2783_vm3, %v2760_v8, %v456_v41  ;;  %vm2861_vm10 = vmor %vm853_vm4, %vm854_vm8  ;;  %v2870_v46 = vpop.f32.mrf.mxu3 }
  0xca   : > { %vm2847_vm9 = vcmp.eq.f32.partialorder %v497_v25, 8.507059e+37  ;;  %v562_v42 = vmul.f32 %v561_v49, %v2733_v43  ;;  %v945_v45 = vmul.f32 %v2824_v12, %v2824_v12  ;;  %v2855_v48 = vmul.f32 0.70710677, %v2827_v15 }
  0xcb   : > { %v852_v54 = vadd.f32 %v2756_v4, %v851_v18  ;;  %v876_v60 = vadd.f32 1.1283791, %v875_v22  ;;  %2401 = vrcp.f32 %v2835_v32  ;;  %v548_v61 = vadd.f32 0.00028619796, %v547_v21 }
  0xcc   : > { %v492_v33 = vadd.f32 %v2763_v10, %v491_v27  ;;  %vm494_vm11 = vweird.f32 %v2763_v10  ;;  %v513_v62 = vmul.f32 %v512_v29, %v2645_v5  ;;  %v908_v0 = vadd.f32 0.00028619796, %v907_v35 }
  0xcd   : > { %v500_v25 = vor.u32 1.1754944e-38, %v499_v34  ;;  %v924_v3 = vmul.f32 %v923_v36, %v2710_v16  ;;  %v602_v7 = vmul.f32 %v601_v28, %v2745_v58  ;;  %v638_v19 = vmul.f32 3.8918573e-05, %v2842_v38  ;;  %vm2885_vm12 = vmor %vm493_vm6, %vm494_vm11 }
  0xce   : > { %v2873_v9 = vpop.eup %2399  ;;  %v462_v26 = vmul.f32 %v461_v13, %v2752_v1  ;;  %v563_v41 = vadd.f32 0.112945676, %v562_v42  ;;  %v2876_v49 = vmin.f32 %v945_v45, 16.0  ;;  %v665_v18 = vmul.f32 %v2855_v48, %v2855_v48 }
  0xcf   : > { %v856_v34 = vsel %vm2861_vm10, %v2756_v4, %v852_v54  ;;  %v2890_v21 = vmul.f32 %v876_v60, %v2634_v59  ;;  %v549_v27 = vmul.f32 %v548_v61, %v2733_v43  ;;  %v496_v29 = vsel %vm2885_vm12, %v2763_v10, %v492_v33 }
  0xd0   : > { %4238 = vst [vmem:[#allocation8_spill] sm:$0xff] %v2876_v49  ;;  %v899_v35 = vand.u32 2147483648, %v2835_v32  ;;  %v514_v4 = vadd.f32 0.18741608, %v513_v62  ;;  %v909_v24 = vmul.f32 %v908_v0, %v2710_v16  ;;  %v529_v28 = vmul.f32 %v2873_v9, %v2804_v31 }
  0xd1   : > { %4241 = vst [vmem:[#allocation9_spill] sm:$0xff] %v2890_v21  ;;  %v2899_v36 = vpop.eup %2401  ;;  %v925_v59 = vadd.f32 0.4994258, %v924_v3  ;;  %v603_v13 = vadd.f32 0.112945676, %v602_v7  ;;  %v2906_v45 = vsel %vm2830_vm7, %v2792_v47, %v856_v34  ;;  %v564_v10 = vmul.f32 %v563_v41, %v2733_v43 }
  0xd2   : > { %v639_v42 = vadd.f32 0.001143296, %v638_v19  ;;  %v958_v54 = vmul.f32 3.8918573e-05, %v2876_v49  ;;  %v2910_v60 = vmin.f32 %v665_v18, 16.0  ;;  %v501_v61 = vsel %vm2847_vm9, %v500_v25, %v496_v29  ;;  %v2931_v29 = vpop.f32.mrf.mxu3 }
  0xd3   : > { %v550_v8 = vadd.f32 0.0036580483, %v549_v27  ;;  %v587_v33 = vmul.f32 2.1237322e-06, %v2745_v58  ;;  %v2304_v62 = vclamps-f32 %v462_v26, 1.0  ;;  %v889_v0 = vmul.f32 %v2899_v36, %v2835_v32 }
  0xd4   : > { %v2917_v3 = vor.u32 1.1754944e-38, %v899_v35  ;;  %v515_v47 = vmul.f32 %v514_v4, %v2645_v5  ;;  %v910_v20 = vadd.f32 0.0036580483, %v909_v24  ;;  %v530_v7 = vsub.f32 1.0, %v529_v28 }
  0xd5   : > { %v926_v19 = vmul.f32 %v925_v59, %v2710_v16  ;;  %v604_v41 = vmul.f32 %v603_v13, %v2745_v58  ;;  %v640_v39 = vmul.f32 %v639_v42, %v2842_v38  ;;  %v2924_v25 = vmul.f32 %v501_v61, %v2799_v57 }
  0xd6   : > { %v2927_v26 = vmul.f32 0.5, %v2682_v55  ;;  %v565_v18 = vadd.f32 0.4994258, %v564_v10  ;;  %v678_v34 = vmul.f32 3.8918573e-05, %v2910_v60  ;;  %v551_v22 = vmul.f32 %v550_v8, %v2733_v43 }
  0xd7   : > { %v959_v5 = vadd.f32 0.001143296, %v958_v54  ;;  %v588_v27 = vadd.f32 0.00028619796, %v587_v33  ;;  %v1185_v35 = vadd.f32 1.0, %v2304_v62  ;;  %v890_v4 = vsub.f32 1.0, %v889_v0 }
  0xd8   : > { %v516_v24 = vadd.f32 1.1283791, %v515_v47  ;;  %v911_v28 = vmul.f32 %v910_v20, %v2710_v16  ;;  %v2935_v57 = vmul.f32 0.5, %v2693_v2  ;;  %v531_v55 = vmul.f32 %v2873_v9, %v530_v7 }
  0xd9   : > { %v2938_v59 = vadd.f32 1.0, %v926_v19  ;;  %v605_v13 = vadd.f32 0.4994258, %v604_v41  ;;  %v641_v42 = vadd.f32 0.014752088, %v640_v39  ;;  %vm893_vm13 = vweird.f32 %v2835_v32 }
  0xda   : > { %vm894_vm14 = vweird.f32 %v2899_v36  ;;  %v566_v10 = vmul.f32 %v565_v18, %v2733_v43  ;;  %v947_v54 = vmul.f32 2.1237322e-06, %v2876_v49  ;;  %v679_v61 = vadd.f32 0.001143296, %v678_v34  ;;  %v351_v34 = vpop.f32.mrf.mxu0 }
  0xdb   : > { %v552_v8 = vadd.f32 0.05243302, %v551_v22  ;;  %v960_v2 = vmul.f32 %v959_v5, %v2876_v49  ;;  %v589_v33 = vmul.f32 %v588_v27, %v2745_v58  ;;  %v1204_v62 = vmul.f32 %v1185_v35, %v2740_v56  ;;  %vm3002_vm5 = vmor %vm893_vm13, %vm894_vm14 }
  0xdc   : > { %v891_v0 = vmul.f32 %v2899_v36, %v890_v4  ;;  %v517_v47 = vmul.f32 %v516_v24, %v2627_v53  ;;  %v912_v20 = vadd.f32 0.05243302, %v911_v28  ;;  %v2951_v7 = vadd.f32 %v2580_v23, %v2870_v46 }
  0xdd   : > { %vm534_vm1 = vweird.f32 %v2873_v9  ;;  %v606_v19 = vmul.f32 %v605_v13, %v2745_v58  ;;  %v627_v41 = vmul.f32 2.1237322e-06, %v2842_v38  ;;  %v642_v39 = vmul.f32 %v641_v42, %v2842_v38  ;;  %2323 = vmatmul.msk.f32.vlgmr.msra.gmra.mxu1 %vm1235_vm15, %v1204_v62 }
  0xde   : > { %4242 = vst [vmem:[#allocation10_spill] sm:$0xff] %v2951_v7  ;;  %2403 = vrcp.f32 %v2938_v59  ;;  %v2959_v56 = vadd.f32 1.0, %v566_v10  ;;  %v948_v53 = vadd.f32 0.00028619796, %v947_v54  ;;  %v680_v18 = vmul.f32 %v679_v61, %v2910_v60  ;;  %v2972_v10 = vpop.f32.mrf.mxu3 }
  0xdf   : > { %v532_v46 = vadd.f32 %v2873_v9, %v531_v55  ;;  %v553_v22 = vmul.f32 %v552_v8, %v2733_v43  ;;  %v961_v5 = vadd.f32 0.014752088, %v960_v2  ;;  %v590_v27 = vadd.f32 0.0036580483, %v589_v33 }
  0xe0   : > { %vm533_vm2 = vweird.f32 %v2804_v31  ;;  %v537_v35 = vand.u32 2147483647, %v2804_v31  ;;  %v539_v4 = vand.u32 2147483648, %v2804_v31  ;;  %v2968_v24 = vmul.f32 0.70710677, %v2951_v7 }
  0xe1   : > { %v2970_v28 = vadd.f32 1.0, %v606_v19  ;;  %v628_v13 = vadd.f32 0.00028619796, %v627_v41  ;;  %v643_v42 = vadd.f32 0.112945676, %v642_v39  ;;  %v2975_v55 = vadd.f32 %v2580_v23, %v351_v34  ;;  %vm2979_vm3 = vmor %vm533_vm2, %vm534_vm1 }
  0xe2   : > { %4243 = vst [vmem:[#allocation11_spill] sm:$0xff] %v2968_v24  ;;  %v913_v31 = vmul.f32 %v912_v20, %v2710_v16  ;;  %2405 = vrcp.f32 %v2959_v56  ;;  %v949_v61 = vmul.f32 %v948_v53, %v2876_v49  ;;  %v681_v8 = vadd.f32 0.014752088, %v680_v18 }
  0xe3   : > { %v536_v2 = vsel %vm2979_vm3, %v2873_v9, %v532_v46  ;;  %v554_v33 = vadd.f32 0.18741608, %v553_v22  ;;  %v962_v62 = vmul.f32 %v961_v5, %v2876_v49  ;;  %v591_v19 = vmul.f32 %v590_v27, %v2745_v58 }
  0xe4   : > { %v2991_v41 = vpop.eup %2403  ;;  %v2994_v39 = vadd.f32 %v2899_v36, %v891_v0  ;;  %vm538_vm4 = vcmp.eq.f32.partialorder %v537_v35, 8.507059e+37  ;;  %v540_v20 = vor.u32 1.1754944e-38, %v539_v4  ;;  %v985_v53 = vmul.f32 %v2968_v24, %v2968_v24 }
  0xe5   : > { %2407 = vrcp.f32 %v2970_v28  ;;  %v629_v18 = vmul.f32 %v628_v13, %v2842_v38  ;;  %v644_v0 = vmul.f32 %v643_v42, %v2842_v38  ;;  %v3010_v34 = vmul.f32 0.70710677, %v2975_v55 }
  0xe6   : > { %v541_v46 = vsel %vm538_vm4, %v540_v20, %v536_v2  ;;  %v914_v22 = vadd.f32 0.18741608, %v913_v31  ;;  %v950_v5 = vadd.f32 0.0036580483, %v949_v61  ;;  %v682_v27 = vmul.f32 %v681_v8, %v2910_v60 }
  0xe7   : > { %v555_v35 = vmul.f32 %v554_v33, %v2733_v43  ;;  %v963_v4 = vadd.f32 0.112945676, %v962_v62  ;;  %v592_v54 = vadd.f32 0.05243302, %v591_v19  ;;  %v705_v1 = vmul.f32 %v3010_v34, %v3010_v34 }
  0xe8   : > { %v3016_v7 = vpop.eup %2405  ;;  %v3024_v42 = vmul.f32 %v2991_v41, %v2938_v59  ;;  %v3026_v31 = vmin.f32 %v985_v53, 16.0  ;;  %v3029_v43 = vmul.f32 0.5, %v2769_v11  ;;  %v630_v61 = vadd.f32 0.0036580483, %v629_v18 }
  0xe9   : > { %v645_v8 = vadd.f32 0.4994258, %v644_v0  ;;  %v3033_v2 = vadd.f32 %v2580_v23, %v2931_v29  ;;  %v3035_v33 = vmin.f32 %v705_v1, 16.0  ;;  %v3037_v62 = vmul.f32 %v541_v46, %v517_v47  ;;  %v3049_v1 = vpop.f32.mrf.mxu3 }
  0xea   : > { %4248 = vst [vmem:[#allocation12_spill] sm:$0xff] %v3024_v42  ;;  %v3040_v19 = vmul.f32 %v914_v22, %v2710_v16  ;;  %v951_v20 = vmul.f32 %v950_v5, %v2876_v49  ;;  %v683_v53 = vadd.f32 0.112945676, %v682_v27  ;;  %v556_v11 = vadd.f32 1.1283791, %v555_v35 }
  0xeb   : > { %4249 = vst [vmem:[#allocation13_spill] sm:$0xff] %v3033_v2  ;;  %v3043_v13 = vpop.eup %2407  ;;  %v569_v18 = vmul.f32 %v3016_v7, %v2959_v56  ;;  %v964_v0 = vmul.f32 %v963_v4, %v2876_v49  ;;  %v593_v29 = vmul.f32 %v592_v54, %v2745_v58  ;;  %v998_v16 = vmul.f32 3.8918573e-05, %v3026_v31 }
  0xec   : > { %v718_v46 = vmul.f32 3.8918573e-05, %v3035_v33  ;;  %v2305_v22 = vclamps-f32 %v2924_v25, 1.0  ;;  %v631_v5 = vmul.f32 %v630_v61, %v2842_v38  ;;  %v646_v27 = vmul.f32 %v645_v8, %v2842_v38 }
  0xed   : > { %v3058_v35 = vmul.f32 0.70710677, %v3033_v2  ;;  %v667_v4 = vmul.f32 2.1237322e-06, %v2910_v60  ;;  %v3061_v54 = vadd.f32 0.05243302, %v951_v20  ;;  %v609_v47 = vmul.f32 %v3043_v13, %v2970_v28  ;;  %v354_v20 = vpop.f32.mrf.mxu0 }
  0xee   : > { %v684_v51 = vmul.f32 %v683_v53, %v2910_v60  ;;  %v719_v24 = vadd.f32 0.001143296, %v718_v46  ;;  %v3067_v37 = vmul.f32 %v556_v11, %v2698_v6  ;;  %v570_v25 = vsub.f32 1.0, %v569_v18 }
  0xef   : > { %4250 = vst [vmem:[#allocation14_spill] sm:$0xff] %v3058_v35  ;;  %v965_v61 = vadd.f32 0.4994258, %v964_v0  ;;  %v594_v12 = vadd.f32 0.18741608, %v593_v29  ;;  %v1186_v50 = vadd.f32 1.0, %v2305_v22  ;;  %vm573_vm6 = vweird.f32 %v2959_v56 }
  0xf0   : > { %4251 = vst [vmem:[#allocation15_spill] sm:$0xff] %v3061_v54  ;;  %v577_v8 = vand.u32 2147483647, %v2959_v56  ;;  %v999_v2 = vadd.f32 0.001143296, %v998_v16  ;;  %v720_v52 = vmul.f32 %v719_v24, %v3035_v33  ;;  %v3072_v30 = vadd.f32 1.0, %v646_v27 }
  0xf1   : > { %v632_v21 = vadd.f32 0.05243302, %v631_v5  ;;  %v1025_v53 = vmul.f32 %v3058_v35, %v3058_v35  ;;  %v668_v6 = vadd.f32 0.00028619796, %v667_v4  ;;  %v579_v11 = vand.u32 2147483648, %v2959_v56 }
  0xf2   : > { %v610_v18 = vsub.f32 1.0, %v609_v47  ;;  %v685_v0 = vadd.f32 0.4994258, %v684_v51  ;;  %v721_v29 = vadd.f32 0.014752088, %v720_v52  ;;  %v571_v16 = vmul.f32 %v3016_v7, %v570_v25 }
  0xf3   : > { %v966_v24 = vmul.f32 %v965_v61, %v2876_v49  ;;  %v595_v46 = vmul.f32 %v594_v12, %v2745_v58  ;;  %v3081_v22 = vadd.f32 %v2580_v23, %v354_v20  ;;  %v987_v5 = vmul.f32 2.1237322e-06, %v3026_v31  ;;  %v384_v58 = vpop.f32.mrf.mxu3 }
  0xf4   : > { %v1000_v27 = vmul.f32 %v999_v2, %v3026_v31  ;;  %v722_v4 = vmul.f32 %v721_v29, %v3035_v33  ;;  %v1205_v35 = vmul.f32 %v1186_v50, %v2743_v40  ;;  %v633_v51 = vmul.f32 %v632_v21, %v2842_v38 }
  0xf5   : > { %4252 = vst [vmem:[#allocation16_spill] sm:$0xff] %v3081_v22  ;;  %2409 = vrcp.f32 %v3072_v30  ;;  %v3089_v52 = vmin.f32 %v1025_v53, 16.0  ;;  %v669_v47 = vmul.f32 %v668_v6, %v2910_v60  ;;  %vm3092_vm7 = vcmp.eq.f32.partialorder %v577_v8, 8.507059e+37 }
  0xf6   : > { %v580_v25 = vor.u32 1.1754944e-38, %v579_v11  ;;  %v611_v2 = vmul.f32 %v3043_v13, %v610_v18  ;;  %v686_v61 = vmul.f32 %v685_v0, %v2910_v60  ;;  %v723_v20 = vadd.f32 0.112945676, %v722_v4  ;;  %2324 = vmatmul.msk.f32.gmra.mxu1 %vm1235_vm15, %v1205_v35 }
  0xf7   : > { %v572_v50 = vadd.f32 %v3016_v7, %v571_v16  ;;  %vm574_vm8 = vweird.f32 %v3016_v7  ;;  %v3101_v40 = vadd.f32 1.0, %v966_v24  ;;  %v3104_v21 = vmul.f32 0.70710677, %v3081_v22 }
  0xf8   : > { %v596_v8 = vadd.f32 1.1283791, %v595_v46  ;;  %v988_v53 = vadd.f32 0.00028619796, %v987_v5  ;;  %v1001_v6 = vadd.f32 0.014752088, %v1000_v27  ;;  %v3107_v11 = vadd.f32 %v2580_v23, %v384_v58  ;;  %vm3113_vm9 = vmor %vm573_vm6, %vm574_vm8 }
  0xf9   : > { %4255 = vst [vmem:[#allocation17_spill] sm:$0xff] %v3101_v40  ;;  %v634_v18 = vadd.f32 0.18741608, %v633_v51  ;;  %v1038_v0 = vmul.f32 3.8918573e-05, %v3089_v52  ;;  %v724_v35 = vmul.f32 %v723_v20, %v3035_v33  ;;  %v612_v24 = vadd.f32 %v3043_v13, %v611_v2 }
  0xfa   : > { %v670_v29 = vadd.f32 0.0036580483, %v669_v47  ;;  %vm614_vm10 = vweird.f32 %v3043_v13  ;;  %v3119_v46 = vadd.f32 1.0, %v686_v61  ;;  %v745_v5 = vmul.f32 %v3104_v21, %v3104_v21 }
  0xfb   : > { %v3123_v27 = vpop.eup %2409  ;;  %v576_v4 = vsel %vm3113_vm9, %v3016_v7, %v572_v50  ;;  %vm613_vm11 = vweird.f32 %v2970_v28  ;;  %v617_v56 = vand.u32 2147483647, %v2970_v28  ;;  %v619_v51 = vand.u32 2147483648, %v2970_v28 }
  0xfc   : > { %v1002_v47 = vmul.f32 %v1001_v6, %v3026_v31  ;;  %v707_v58 = vmul.f32 2.1237322e-06, %v3035_v33  ;;  %v3133_v2 = vmin.f32 %v745_v5, 16.0  ;;  %v3136_v61 = vmul.f32 0.70710677, %v3107_v11  ;;  %vm3138_vm12 = vmor %vm613_vm11, %vm614_vm10 }
  0xfd   : > { %v635_v7 = vmul.f32 %v634_v18, %v2842_v38  ;;  %v1039_v50 = vadd.f32 0.001143296, %v1038_v0  ;;  %v671_v16 = vmul.f32 %v670_v29, %v2910_v60  ;;  %v725_v22 = vadd.f32 0.4994258, %v724_v35 }
  0xfe   : > { %v616_v28 = vsel %vm3138_vm12, %v3043_v13, %v612_v24  ;;  %v649_v6 = vmul.f32 %v3123_v27, %v3072_v30  ;;  %2411 = vrcp.f32 %v3119_v46  ;;  %v758_v5 = vmul.f32 3.8918573e-05, %v3133_v2 }
  0xff   : > { %v581_v54 = vsel %vm3092_vm7, %v580_v25, %v576_v4  ;;  %vm618_vm13 = vcmp.eq.f32.partialorder %v617_v56, 8.507059e+37  ;;  %v620_v38 = vor.u32 1.1754944e-38, %v619_v51  ;;  %v3155_v18 = vadd.f32 %v2580_v23, %v2972_v10 }
 0x100   : > { %v1003_v0 = vadd.f32 0.112945676, %v1002_v47  ;;  %v708_v29 = vadd.f32 0.00028619796, %v707_v58  ;;  %v759_v35 = vadd.f32 0.001143296, %v758_v5  ;;  %v1145_v13 = vmul.f32 %v3136_v61, %v3136_v61 }
 0x101   : > { %4260 = vst [vmem:[#allocation18_spill] sm:$0xff] %v3155_v18  ;;  %v621_v24 = vsel %vm618_vm13, %v620_v38, %v616_v28  ;;  %v636_v20 = vadd.f32 1.1283791, %v635_v7  ;;  %v672_v49 = vadd.f32 0.05243302, %v671_v16  ;;  %v726_v42 = vmul.f32 %v725_v22, %v3035_v33 }
 0x102   : > { %2413 = vrcp.f32 %v3101_v40  ;;  %v597_v12 = vmul.f32 %v596_v8, %v2713_v17  ;;  %v650_v25 = vsub.f32 1.0, %v649_v6  ;;  %v1040_v4 = vmul.f32 %v1039_v50, %v3089_v52 }
 0x103   : > { %v3164_v10 = vmul.f32 %v581_v54, %v3067_v37  ;;  %v3167_v56 = vmul.f32 %v988_v53, %v3026_v31  ;;  %v3170_v51 = vmul.f32 0.70710677, %v3155_v18  ;;  %v760_v47 = vmul.f32 %v759_v35, %v3133_v2  ;;  %v357_v37 = vpop.f32.mrf.mxu0 }
 0x104   : > { %v3173_v58 = vpop.eup %2411  ;;  %v3175_v22 = vmul.f32 %v621_v24, %v597_v12  ;;  %v3178_v17 = vmul.f32 %v1003_v0, %v3026_v31  ;;  %v709_v8 = vmul.f32 %v708_v29, %v3035_v33  ;;  %v3181_v7 = vmin.f32 %v1145_v13, 16.0 }
 0x105   : > { %4261 = vst [vmem:[#allocation19_spill] sm:$0xff] %v3170_v51  ;;  %v3184_v54 = vmul.f32 %v636_v20, %v2789_v44  ;;  %v673_v53 = vmul.f32 %v672_v49, %v2910_v60  ;;  %v3187_v50 = vadd.f32 1.0, %v726_v42  ;;  %v761_v16 = vadd.f32 0.014752088, %v760_v47 }
 0x106   : > { %v651_v28 = vmul.f32 %v3123_v27, %v650_v25  ;;  %v3190_v6 = vadd.f32 0.014752088, %v1040_v4  ;;  %v1147_v5 = vmul.f32 2.1237322e-06, %v3181_v7  ;;  %v2306_v38 = vclamps-f32 %v3037_v62, 1.0 }
 0x107   : > { %v689_v0 = vmul.f32 %v3173_v58, %v3119_v46  ;;  %v1065_v44 = vmul.f32 %v3170_v51, %v3170_v51  ;;  %v762_v29 = vmul.f32 %v761_v16, %v3133_v2  ;;  %v3200_v49 = vadd.f32 %v2580_v23, %v357_v37 }
 0x108   : > { %v3202_v42 = vpop.eup %2413  ;;  %vm653_vm14 = vweird.f32 %v3072_v30  ;;  %v657_v35 = vand.u32 2147483647, %v3072_v30  ;;  %v659_v13 = vand.u32 2147483648, %v3072_v30  ;;  %v710_v62 = vadd.f32 0.0036580483, %v709_v8 }
 0x109   : > { %4262 = vst [vmem:[#allocation20_spill] sm:$0xff] %v3200_v49  ;;  %vm654_vm1 = vweird.f32 %v3123_v27  ;;  %v674_v24 = vadd.f32 0.18741608, %v673_v53  ;;  %2415 = vrcp.f32 %v3187_v50  ;;  %v747_v20 = vmul.f32 2.1237322e-06, %v3133_v2 }
 0x10a   : > { %4263 = vst [vmem:[#allocation21_spill] sm:$0xff] %v3202_v42  ;;  %v652_v12 = vadd.f32 %v3123_v27, %v651_v28  ;;  %v763_v23 = vadd.f32 0.112945676, %v762_v29  ;;  %v1148_v25 = vadd.f32 0.00028619796, %v1147_v5  ;;  %v1187_v4 = vadd.f32 1.0, %v2306_v38  ;;  %vm3225_vm2 = vmor %vm653_vm14, %vm654_vm1 }
 0x10b   : > { %v690_v47 = vsub.f32 1.0, %v689_v0  ;;  %v3211_v37 = vmin.f32 %v1065_v44, 16.0  ;;  %v1158_v16 = vmul.f32 3.8918573e-05, %v3181_v7  ;;  %v3215_v18 = vmul.f32 0.70710677, %v3200_v49 }
 0x10c   : > { %v711_v8 = vmul.f32 %v710_v62, %v3035_v33  ;;  %v764_v53 = vmul.f32 %v763_v23, %v3133_v2  ;;  %v1149_v51 = vmul.f32 %v1148_v25, %v3181_v7  ;;  %v1206_v42 = vmul.f32 %v1187_v4, %v2748_v63 }
 0x10d   : > { %vm3229_vm3 = vcmp.eq.f32.partialorder %v657_v35, 8.507059e+37  ;;  %v675_v38 = vmul.f32 %v674_v24, %v2910_v60  ;;  %v748_v0 = vadd.f32 0.00028619796, %v747_v20  ;;  %v1159_v44 = vadd.f32 0.001143296, %v1158_v16 }
 0x10e   : > { %v656_v63 = vsel %vm3225_vm2, %v3123_v27, %v652_v12  ;;  %v765_v29 = vadd.f32 0.4994258, %v764_v53  ;;  %v1150_v62 = vadd.f32 0.0036580483, %v1149_v51  ;;  %2325 = vmatmul.msk.f32.gmra.mxu1 %vm1235_vm15, %v1206_v42  ;;  %v785_v30 = vmul.f32 %v3215_v18, %v3215_v18  ;;  %v2469_v60 = vld [vmem:[%s4197_s2] ss:$0 sm:$0xff] }
 0x10f   : > { %v3240_v23 = vpop.eup %2415  ;;  %v660_v35 = vor.u32 1.1754944e-38, %v659_v13  ;;  %v3243_v25 = vmul.f32 3.8918573e-05, %v3211_v37  ;;  %v3249_v24 = vadd.f32 %v2469_v60, %v3049_v1  ;;  %v1160_v27 = vmul.f32 %v1159_v44, %v3181_v7 }
 0x110   : > { %v691_v51 = vmul.f32 %v3173_v58, %v690_v47  ;;  %v712_v42 = vadd.f32 0.05243302, %v711_v8  ;;  %v766_v20 = vmul.f32 %v765_v29, %v3133_v2  ;;  %v3254_v12 = vmin.f32 %v785_v30, 16.0 }
 0x111   : > { %4268 = vst [vmem:[#allocation22_spill] sm:$0xff] %v3249_v24  ;;  %v661_v13 = vsel %vm3229_vm3, %v660_v35, %v656_v63  ;;  %v676_v4 = vadd.f32 1.1283791, %v675_v38  ;;  %v749_v16 = vmul.f32 %v748_v0, %v3133_v2  ;;  %v1161_v53 = vadd.f32 0.014752088, %v1160_v27 }
 0x112   : > { %v729_v1 = vmul.f32 %v3240_v23, %v3187_v50  ;;  %v3261_v28 = vadd.f32 1.0, %v766_v20  ;;  %v1151_v44 = vmul.f32 %v1150_v62, %v3181_v7  ;;  %v787_v47 = vmul.f32 2.1237322e-06, %v3254_v12 }
 0x113   : > { %v699_v8 = vand.u32 2147483648, %v3119_v46  ;;  %v3267_v29 = vmul.f32 0.70710677, %v3249_v24  ;;  %v1162_v5 = vmul.f32 %v1161_v53, %v3181_v7  ;;  %v798_v38 = vmul.f32 3.8918573e-05, %v3254_v12 }
 0x114   : > { %v692_v0 = vadd.f32 %v3173_v58, %v691_v51  ;;  %vm694_vm4 = vweird.f32 %v3173_v58  ;;  %v713_v63 = vmul.f32 %v712_v42, %v3035_v33  ;;  %v2307_v30 = vclamps-f32 %v3164_v10, 1.0 }
 0x115   : > { %v750_v62 = vadd.f32 0.0036580483, %v749_v16  ;;  %2417 = vrcp.f32 %v3261_v28  ;;  %v1163_v35 = vadd.f32 0.112945676, %v1162_v5  ;;  %v788_v60 = vadd.f32 0.00028619796, %v787_v47 }
 0x116   : > { %v677_v27 = vmul.f32 %v676_v4, %v2855_v48  ;;  %v730_v20 = vsub.f32 1.0, %v729_v1  ;;  %v1152_v24 = vadd.f32 0.05243302, %v1151_v44  ;;  %v799_v53 = vadd.f32 0.001143296, %v798_v38 }
 0x117   : > { %vm693_vm6 = vweird.f32 %v3119_v46  ;;  %v697_v51 = vand.u32 2147483647, %v3119_v46  ;;  %v1164_v49 = vmul.f32 %v1163_v35, %v3181_v7  ;;  %v789_v42 = vmul.f32 %v788_v60, %v3254_v12 }
 0x118   : > { %vm3283_vm7 = vmor %vm693_vm6, %vm694_vm4  ;;  %v700_v16 = vor.u32 1.1754944e-38, %v699_v8  ;;  %v800_v48 = vmul.f32 %v799_v53, %v3254_v12  ;;  %v1188_v4 = vadd.f32 1.0, %v2307_v30  ;;  %v2308_v1 = vclamps-f32 %v3175_v22, 1.0 }
 0x119   : > { %v696_v46 = vsel %vm3283_vm7, %v3173_v58, %v692_v0  ;;  %v714_v44 = vadd.f32 0.18741608, %v713_v63  ;;  %v751_v47 = vmul.f32 %v750_v62, %v3133_v2  ;;  %v1165_v5 = vadd.f32 0.4994258, %v1164_v49 }
 0x11a   : > { %v731_v38 = vmul.f32 %v3240_v23, %v730_v20  ;;  %v1153_v35 = vmul.f32 %v1152_v24, %v3181_v7  ;;  %v801_v60 = vadd.f32 0.014752088, %v800_v48  ;;  %v1207_v8 = vmul.f32 %v1188_v4, %v2927_v26 }
 0x11b   : > { %v3296_v40 = vpop.eup %2417  ;;  %v662_v30 = vmul.f32 %v661_v13, %v3184_v54  ;;  %vm698_vm8 = vcmp.eq.f32.partialorder %v697_v51, 8.507059e+37  ;;  %v1166_v22 = vmul.f32 %v1165_v5, %v3181_v7  ;;  %v790_v53 = vadd.f32 0.0036580483, %v789_v42 }
 0x11c   : > { %v701_v58 = vsel %vm698_vm8, %v700_v16, %v696_v46  ;;  %v1105_v0 = vmul.f32 %v3267_v29, %v3267_v29  ;;  %v802_v49 = vmul.f32 %v801_v60, %v3254_v12  ;;  %2326 = vmatmul.msk.f32.gmra.mxu1 %vm1235_vm15, %v1207_v8  ;;  %v1189_v24 = vadd.f32 1.0, %v2308_v1 }
 0x11d   : > { %v715_v63 = vmul.f32 %v714_v44, %v3035_v33  ;;  %vm734_vm9 = vweird.f32 %v3240_v23  ;;  %v752_v26 = vadd.f32 0.05243302, %v751_v47  ;;  %v3306_v62 = vadd.f32 1.0, %v1166_v22 }
 0x11e   : > { %v732_v54 = vadd.f32 %v3240_v23, %v731_v38  ;;  %v769_v13 = vmul.f32 %v3296_v40, %v3261_v28  ;;  %v1154_v20 = vadd.f32 0.18741608, %v1153_v35  ;;  %v803_v51 = vadd.f32 0.112945676, %v802_v49 }
 0x11f   : > { %v739_v42 = vand.u32 2147483648, %v3187_v50  ;;  %2419 = vrcp.f32 %v3306_v62  ;;  %v791_v10 = vmul.f32 %v790_v53, %v3254_v12  ;;  %v2309_v16 = vclamps-f32 %v662_v30, 1.0 }
 0x120   : > { %vm733_vm10 = vweird.f32 %v3187_v50  ;;  %v737_v33 = vand.u32 2147483647, %v3187_v50  ;;  %v804_v48 = vmul.f32 %v803_v51, %v3254_v12  ;;  %v1208_v4 = vmul.f32 %v1189_v24, %v2935_v57 }
 0x121   : > { %v1005_v1 = vadd.f32 0.4994258, %v3178_v17  ;;  %v702_v46 = vmul.f32 %v701_v58, %v677_v27  ;;  %v716_v44 = vadd.f32 1.1283791, %v715_v63  ;;  %vm3321_vm11 = vmor %vm733_vm10, %vm734_vm9  ;;  %v753_v5 = vmul.f32 %v752_v26, %v3133_v2 }
 0x122   : > { %v736_v50 = vsel %vm3321_vm11, %v3240_v23, %v732_v54  ;;  %v770_v38 = vsub.f32 1.0, %v769_v13  ;;  %v1155_v35 = vmul.f32 %v1154_v20, %v3181_v7  ;;  %v805_v57 = vadd.f32 0.4994258, %v804_v48 }
 0x123   : > { %v1042_v17 = vmul.f32 %v3190_v6, %v3089_v52  ;;  %v740_v27 = vor.u32 1.1754944e-38, %v739_v42  ;;  %v792_v60 = vadd.f32 0.05243302, %v791_v10  ;;  %v1190_v8 = vadd.f32 1.0, %v2309_v16 }
 0x124   : > { %v1079_v30 = vadd.f32 0.001143296, %v3243_v25  ;;  %vm738_vm12 = vcmp.eq.f32.partialorder %v737_v33, 8.507059e+37  ;;  %v3333_v22 = vmin.f32 %v1105_v0, 16.0  ;;  %v806_v53 = vmul.f32 %v805_v57, %v3254_v12  ;;  %2327 = vmatmul.msk.f32.gmra.mxu1 %vm1235_vm15, %v1208_v4 }
 0x125   : > { %v2420_v23 = vpop.eup %2419  ;;  %v717_v58 = vmul.f32 %v716_v44, %v3010_v34  ;;  %v741_v7 = vsel %vm738_vm12, %v740_v27, %v736_v50  ;;  %v754_v49 = vadd.f32 0.18741608, %v753_v5  ;;  %v2310_v24 = vclamps-f32 %v702_v46, 1.0 }
 0x126   : > { %v771_v6 = vmul.f32 %v3296_v40, %v770_v38  ;;  %v1156_v63 = vadd.f32 1.1283791, %v1155_v35  ;;  %v1169_v26 = vmul.f32 %v2420_v23, %v3306_v62  ;;  %v3340_v54 = vadd.f32 1.0, %v806_v53 }
 0x127   : > { %vm1173_vm13 = vweird.f32 %v3306_v62  ;;  %v1179_v25 = vand.u32 2147483648, %v3306_v62  ;;  %v793_v0 = vmul.f32 %v792_v60, %v3254_v12  ;;  %v1209_v13 = vmul.f32 %v1190_v8, %v3029_v43 }
 0x128   : > { %v1170_v20 = vsub.f32 1.0, %v1169_v26  ;;  %vm1174_vm14 = vweird.f32 %v2420_v23  ;;  %v1177_v34 = vand.u32 2147483647, %v3306_v62  ;;  %2421 = vrcp.f32 %v3340_v54 }
 0x129   : > { %v1080_v51 = vmul.f32 %v1079_v30, %v3211_v37  ;;  %v742_v42 = vmul.f32 %v741_v7, %v717_v58  ;;  %v1118_v10 = vmul.f32 3.8918573e-05, %v3333_v22  ;;  %v755_v16 = vmul.f32 %v754_v49, %v3133_v2  ;;  %vm3358_vm3 = vmor %vm1173_vm13, %vm1174_vm14 }
 0x12a   : > { %v772_v33 = vadd.f32 %v3296_v40, %v771_v6  ;;  %vm773_vm1 = vweird.f32 %v3261_v28  ;;  %vm774_vm2 = vweird.f32 %v3296_v40  ;;  %v1171_v43 = vmul.f32 %v2420_v23, %v1170_v20 }
 0x12b   : > { %v777_v48 = vand.u32 2147483647, %v3261_v28  ;;  %v779_v4 = vand.u32 2147483648, %v3261_v28  ;;  %v1180_v44 = vor.u32 1.1754944e-38, %v1179_v25  ;;  %v794_v47 = vadd.f32 0.18741608, %v793_v0  ;;  %vm3370_vm6 = vmor %vm773_vm1, %vm774_vm2 }
 0x12c   : > { %v1157_v2 = vmul.f32 %v1156_v63, %v3136_v61  ;;  %v1172_v5 = vadd.f32 %v2420_v23, %v1171_v43  ;;  %vm1178_vm4 = vcmp.eq.f32.partialorder %v1177_v34, 8.507059e+37  ;;  %2328 = vmatmul.msk.f32.gmra.mxu1 %vm1235_vm15, %v1209_v13  ;;  %v1191_v50 = vadd.f32 1.0, %v2310_v24 }
 0x12d   : > { %v1006_v38 = vmul.f32 %v1005_v1, %v3026_v31  ;;  %v1043_v35 = vadd.f32 0.112945676, %v1042_v17  ;;  %v393_v57 = vmul.f32 0.5, %v2827_v15  ;;  %v1081_v27 = vadd.f32 0.014752088, %v1080_v51 }
 0x12e   : > { %v2422_v61 = vpop.eup %2421  ;;  %v4277_v60 = vand.u32 2147483647, %v2835_v32  ;;  %v1119_v1 = vadd.f32 0.001143296, %v1118_v10  ;;  %v756_v17 = vadd.f32 1.1283791, %v755_v16  ;;  %v776_v15 = vsel %vm3370_vm6, %v3296_v40, %v772_v33 }
 0x12f   : > { %v1176_v28 = vsel %vm3358_vm3, %v2420_v23, %v1172_v5  ;;  %v780_v30 = vor.u32 1.1754944e-38, %v779_v4  ;;  %v795_v58 = vmul.f32 %v794_v47, %v3254_v12  ;;  %v809_v7 = vmul.f32 %v2422_v61, %v3340_v54 }
 0x130   : > { %vm3376_vm7 = vcmp.eq.f32.partialorder %v4277_v60, 8.507059e+37  ;;  %v1181_v53 = vsel %vm1178_vm4, %v1180_v44, %v1176_v28  ;;  %vm778_vm8 = vcmp.eq.f32.partialorder %v777_v48, 8.507059e+37  ;;  %v1210_v49 = vmul.f32 %v1191_v50, %v393_v57  ;;  %v4283_v60 = vld [vmem:[#allocation8_spill] sm:$0xff] }
 0x131   : > { %v1182_v32 = vmul.f32 %v1181_v53, %v1157_v2  ;;  %v2311_v24 = vclamps-f32 %v742_v42, 1.0  ;;  %v1044_v6 = vmul.f32 %v1043_v35, %v3089_v52  ;;  %v1082_v63 = vmul.f32 %v1081_v27, %v3211_v37  ;;  %v4287_v53 = vld [vmem:[#allocation20_spill] sm:$0xff] }
 0x132   : > { %v781_v26 = vsel %vm778_vm8, %v780_v30, %v776_v15  ;;  %v810_v25 = vsub.f32 1.0, %v809_v7  ;;  %v757_v40 = vmul.f32 %v756_v17, %v3104_v21  ;;  %v405_v23 = vmul.f32 0.5, %v3107_v11  ;;  %v4285_v17 = vld [vmem:[#allocation17_spill] sm:$0xff] }
 0x133   : > { %v2322_v0 = vclamps-f32 %v1182_v32, 1.0  ;;  %v819_v13 = vand.u32 2147483648, %v3340_v54  ;;  %v796_v12 = vadd.f32 1.1283791, %v795_v58  ;;  %vm814_vm9 = vweird.f32 %v2422_v61  ;;  %v4286_v15 = vld [vmem:[#allocation21_spill] sm:$0xff] }
 0x134   : > { %v811_v20 = vmul.f32 %v2422_v61, %v810_v25  ;;  %v817_v34 = vand.u32 2147483647, %v3340_v54  ;;  %v1120_v51 = vmul.f32 %v1119_v1, %v3333_v22  ;;  %v782_v42 = vmul.f32 %v781_v26, %v757_v40  ;;  %2329 = vmatmul.msk.f32.gmra.mxu1 %vm1235_vm15, %v1210_v49 }
 0x135   : > { %v1203_v10 = vadd.f32 1.0, %v2322_v0  ;;  %v1192_v16 = vadd.f32 1.0, %v2311_v24  ;;  %v3395_v33 = vadd.f32 1.0, %v1006_v38  ;;  %v1027_v21 = vmul.f32 2.1237322e-06, %v3089_v52 }
 0x136   : > { %v812_v11 = vadd.f32 %v2422_v61, %v811_v20  ;;  %vm813_vm10 = vweird.f32 %v3340_v54  ;;  %v1045_v43 = vadd.f32 0.4994258, %v1044_v6  ;;  %v394_v48 = vmul.f32 0.5, %v2975_v55  ;;  %v4288_v6 = vld [vmem:[#allocation16_spill] sm:$0xff] }
 0x137   : > { %v1222_v4 = vmul.f32 %v1203_v10, %v405_v23  ;;  %vm815_vm11 = vmor %vm813_vm10, %vm814_vm9  ;;  %v820_v46 = vor.u32 1.1754944e-38, %v819_v13  ;;  %v1083_v44 = vadd.f32 0.112945676, %v1082_v63  ;;  %v797_v47 = vmul.f32 %v796_v12, %v3215_v18 }
 0x138   : > { %v816_v2 = vsel %vm815_vm11, %v2422_v61, %v812_v11  ;;  %vm818_vm12 = vcmp.eq.f32.partialorder %v817_v34, 8.507059e+37  ;;  %v1121_v5 = vadd.f32 0.014752088, %v1120_v51  ;;  %v1211_v38 = vmul.f32 %v1192_v16, %v394_v48 }
 0x139   : > { %v821_v50 = vsel %vm818_vm12, %v820_v46, %v816_v2  ;;  %v2312_v35 = vclamps-f32 %v782_v42, 1.0  ;;  %2341 = vmatmul.msk.f32.vlgmr.msrb.gmra.mxu3 %vm1235_vm15, %v1222_v4  ;;  %v862_v54 = vmul.f32 %v2906_v45, %v2773_v14  ;;  %v4280_v55 = vsel %vm3002_vm5, %v2899_v36, %v2994_v39  ;;  %v4281_v14 = vld [vmem:[#allocation12_spill] sm:$0xff]  ;;  %v4284_v36 = vld [vmem:[#allocation15_spill] sm:$0xff]  ;;  %v4292_v4 = vld [vmem:[#allocation9_spill] sm:$0xff] }
 0x13a   : > { %v901_v18 = vsel %vm3376_vm7, %v2917_v3, %v4280_v55  ;;  %v990_v57 = vadd.f32 0.0036580483, %v3167_v56  ;;  %v822_v27 = vmul.f32 %v821_v50, %v797_v47  ;;  %v916_v62 = vadd.f32 1.1283791, %v3040_v19  ;;  %v4293_v2 = vld [vmem:[#allocation5_spill] sm:$0xff] }
 0x13b   : > { %vm933_vm13 = vweird.f32 %v2938_v59  ;;  %vm934_vm14 = vweird.f32 %v2991_v41  ;;  %v1028_v61 = vadd.f32 0.00028619796, %v1027_v21  ;;  %v4282_v45 = vsub.f32 1.0, %v4281_v14  ;;  %v4291_v21 = vld [vmem:[#allocation2_spill] sm:$0xff] }
 0x13c   : > { %v953_v39 = vmul.f32 %v4284_v36, %v4283_v60  ;;  %2423 = vrcp.f32 %v3395_v33  ;;  %v2313_v3 = vclamps-f32 %v822_v27, 1.0  ;;  %v1046_v56 = vmul.f32 %v1045_v43, %v3089_v52  ;;  %2330 = vmatmul.msk.f32.gmra.mxu1 %vm1235_vm15, %v1211_v38  ;;  %vm3440_vm5 = vmor %vm933_vm13, %vm934_vm14 }
 0x13d   : > { %v931_v9 = vmul.f32 %v2991_v41, %v4282_v45  ;;  %v1084_v8 = vmul.f32 %v1083_v44, %v3211_v37  ;;  %v1122_v19 = vmul.f32 %v1121_v5, %v3333_v22  ;;  %v1193_v1 = vadd.f32 1.0, %v2312_v35 }
 0x13e   : > { %v969_v28 = vmul.f32 %v4286_v15, %v4285_v17  ;;  %v991_v30 = vmul.f32 %v990_v57, %v3026_v31  ;;  %v396_v58 = vmul.f32 0.5, %v4287_v53  ;;  %v1194_v7 = vadd.f32 1.0, %v2313_v3 }
 0x13f   : > { %v939_v32 = vand.u32 2147483648, %v2938_v59  ;;  %v1029_v49 = vmul.f32 %v1028_v61, %v3089_v52  ;;  %v1067_v24 = vmul.f32 2.1237322e-06, %v3211_v37  ;;  %v395_v63 = vmul.f32 0.5, %v4288_v6 }
 0x140   : > { %v932_v26 = vadd.f32 %v2991_v41, %v931_v9  ;;  %v937_v25 = vand.u32 2147483647, %v2938_v59  ;;  %v1213_v40 = vmul.f32 %v1194_v7, %v396_v58  ;;  %v2314_v23 = vclamps-f32 %v862_v54, 1.0 }
 0x141   : > { %v3444_v13 = vadd.f32 1.0, %v1046_v56  ;;  %v1085_v12 = vadd.f32 0.4994258, %v1084_v8  ;;  %v1123_v20 = vadd.f32 0.112945676, %v1122_v19  ;;  %v1212_v34 = vmul.f32 %v1193_v1, %v395_v63 }
 0x142   : > { %v3446_v51 = vpop.eup %2423  ;;  %v954_v42 = vadd.f32 0.18741608, %v953_v39  ;;  %v970_v10 = vsub.f32 1.0, %v969_v28  ;;  %v992_v16 = vadd.f32 0.05243302, %v991_v30  ;;  %2332 = vmatmul.msk.f32.vlgmr.msra.gmra.mxu2 %vm1235_vm15, %v1213_v40  ;;  %v397_v11 = vmul.f32 0.5, %v4291_v21 }
 0x143   : > { %v940_v43 = vor.u32 1.1754944e-38, %v939_v32  ;;  %v1030_v59 = vadd.f32 0.0036580483, %v1029_v49  ;;  %v1068_v48 = vadd.f32 0.00028619796, %v1067_v24  ;;  %v902_v46 = vmul.f32 %v901_v18, %v4292_v4 }
 0x144   : > { %v936_v44 = vsel %vm3440_vm5, %v2991_v41, %v932_v26  ;;  %vm938_vm1 = vcmp.eq.f32.partialorder %v937_v25, 8.507059e+37  ;;  %v1195_v47 = vadd.f32 1.0, %v2314_v23  ;;  %v917_v5 = vmul.f32 %v916_v62, %v4293_v2  ;;  %2331 = vmatmul.msk.f32.gmra.mxu1 %vm1235_vm15, %v1212_v34  ;;  %v4299_v23 = vld [vmem:[#allocation7_spill] sm:$0xff]  ;;  %v4302_v2 = vld [vmem:[#allocation4_spill] sm:$0xff] }
 0x145   : > { %2425 = vrcp.f32 %v3444_v13  ;;  %v1086_v50 = vmul.f32 %v1085_v12, %v3211_v37  ;;  %v1124_v38 = vmul.f32 %v1123_v20, %v3333_v22  ;;  %v955_v35 = vmul.f32 %v954_v42, %v4283_v60 }
 0x146   : > { %v971_v54 = vmul.f32 %v4286_v15, %v970_v10  ;;  %v993_v55 = vmul.f32 %v992_v16, %v3026_v31  ;;  %v1009_v41 = vmul.f32 %v3446_v51, %v3395_v33  ;;  %v941_v18 = vsel %vm938_vm1, %v940_v43, %v936_v44 }
 0x147   : > { %v1031_v57 = vmul.f32 %v1030_v59, %v3089_v52  ;;  %v1069_v27 = vmul.f32 %v1068_v48, %v3211_v37  ;;  %v1107_v62 = vmul.f32 2.1237322e-06, %v3333_v22  ;;  %vm973_vm2 = vweird.f32 %v4285_v17 }
 0x148   : > { %vm974_vm3 = vweird.f32 %v4286_v15  ;;  %v1214_v61 = vmul.f32 %v1195_v47, %v397_v11  ;;  %v2315_v14 = vclamps-f32 %v902_v46, 1.0  ;;  %v977_v45 = vand.u32 2147483647, %v4285_v17 }
 0x149   : > { %v979_v9 = vand.u32 2147483648, %v4285_v17  ;;  %v3471_v60 = vadd.f32 1.0, %v1086_v50  ;;  %v1125_v36 = vadd.f32 0.4994258, %v1124_v38  ;;  %v956_v39 = vadd.f32 1.1283791, %v955_v35  ;;  %vm3477_vm4 = vmor %vm973_vm2, %vm974_vm3 }
 0x14a   : > { %v972_v3 = vadd.f32 %v4286_v15, %v971_v54  ;;  %v994_v56 = vadd.f32 0.18741608, %v993_v55  ;;  %v1010_v8 = vsub.f32 1.0, %v1009_v41  ;;  %2333 = vmatmul.msk.f32.gmra.mxu2 %vm1235_vm15, %v1214_v61  ;;  %v1032_v28 = vadd.f32 0.05243302, %v1031_v57  ;;  %v4296_v17 = vld [vmem:[#allocation3_spill] sm:$0xff] }
 0x14b   : > { %v3475_v19 = vpop.eup %2425  ;;  %v1070_v30 = vadd.f32 0.0036580483, %v1069_v27  ;;  %v1108_v53 = vadd.f32 0.00028619796, %v1107_v62  ;;  %v398_v58 = vmul.f32 0.5, %v4296_v17  ;;  %v942_v7 = vmul.f32 %v941_v18, %v917_v5  ;;  %v4303_v41 = vld [vmem:[#allocation11_spill] sm:$0xff] }
 0x14c   : > { %v1196_v32 = vadd.f32 1.0, %v2315_v14  ;;  %vm3482_vm6 = vcmp.eq.f32.partialorder %v977_v45, 8.507059e+37  ;;  %v980_v24 = vor.u32 1.1754944e-38, %v979_v9  ;;  %2427 = vrcp.f32 %v3471_v60  ;;  %v3532_v14 = vld [vmem:[%s4199_s4] ss:$0 sm:$0xff] }
 0x14d   : > { %v1126_v6 = vmul.f32 %v1125_v36, %v3333_v22  ;;  %v976_v63 = vsel %vm3477_vm4, %v4286_v15, %v972_v3  ;;  %v995_v26 = vmul.f32 %v994_v56, %v3026_v31  ;;  %v1011_v25 = vmul.f32 %v3446_v51, %v1010_v8 }
 0x14e   : > { %v1049_v40 = vmul.f32 %v3475_v19, %v3444_v13  ;;  %v957_v0 = vmul.f32 %v956_v39, %v4299_v23  ;;  %v1033_v12 = vmul.f32 %v1032_v28, %v3089_v52  ;;  %v1071_v20 = vmul.f32 %v1070_v30, %v3211_v37 }
 0x14f   : > { %v1109_v34 = vmul.f32 %v1108_v53, %v3333_v22  ;;  %vm1013_vm7 = vweird.f32 %v3395_v33  ;;  %vm1014_vm8 = vweird.f32 %v3446_v51  ;;  %v1215_v15 = vmul.f32 %v1196_v32, %v398_v58  ;;  %v4306_v53 = vld [vmem:[#allocation6_spill] sm:$0xff] }
 0x150   : > { %v2316_v42 = vclamps-f32 %v942_v7, 1.0  ;;  %v981_v31 = vsel %vm3482_vm6, %v980_v24, %v976_v63  ;;  %v1019_v10 = vand.u32 2147483648, %v3395_v33  ;;  %v3504_v16 = vadd.f32 1.0, %v1126_v6  ;;  %vm3511_vm9 = vmor %vm1013_vm7, %vm1014_vm8 }
 0x151   : > { %v996_v21 = vadd.f32 1.1283791, %v995_v26  ;;  %v1012_v11 = vadd.f32 %v3446_v51, %v1011_v25  ;;  %v1017_v43 = vand.u32 2147483647, %v3395_v33  ;;  %v1050_v59 = vsub.f32 1.0, %v1049_v40  ;;  %v4307_v26 = vld [vmem:[#allocation14_spill] sm:$0xff] }
 0x152   : > { %2334 = vmatmul.msk.f32.gmra.mxu2 %vm1235_vm15, %v1215_v15  ;;  %v3509_v48 = vpop.eup %2427  ;;  %v1034_v46 = vadd.f32 0.18741608, %v1033_v12  ;;  %v1072_v44 = vadd.f32 0.05243302, %v1071_v20  ;;  %v1110_v47 = vadd.f32 0.0036580483, %v1109_v34  ;;  %v982_v50 = vmul.f32 %v981_v31, %v957_v0 }
 0x153   : > { %v399_v5 = vmul.f32 0.5, %v4302_v2  ;;  %v1197_v38 = vadd.f32 1.0, %v2316_v42  ;;  %v1020_v35 = vor.u32 1.1754944e-38, %v1019_v10  ;;  %2429 = vrcp.f32 %v3504_v16  ;;  %v4308_v10 = vld [vmem:[#allocation10_spill] sm:$0xff] }
 0x154   : > { %v1016_v33 = vsel %vm3511_vm9, %v3446_v51, %v1012_v11  ;;  %vm1018_vm10 = vcmp.eq.f32.partialorder %v1017_v43, 8.507059e+37  ;;  %v1051_v54 = vmul.f32 %v3475_v19, %v1050_v59  ;;  %v1089_v55 = vmul.f32 %v3509_v48, %v3471_v60 }
 0x155   : > { %v997_v18 = vmul.f32 %v996_v21, %v4303_v41  ;;  %v1035_v57 = vmul.f32 %v1034_v46, %v3089_v52  ;;  %v1073_v27 = vmul.f32 %v1072_v44, %v3211_v37  ;;  %v1111_v62 = vmul.f32 %v1110_v47, %v3333_v22 }
 0x156   : > { %vm1053_vm11 = vweird.f32 %v3444_v13  ;;  %vm1054_vm12 = vweird.f32 %v3475_v19  ;;  %v1216_v61 = vmul.f32 %v1197_v38, %v399_v5  ;;  %v2317_v51 = vclamps-f32 %v982_v50, 1.0 }
 0x157   : > { %v1021_v45 = vsel %vm1018_vm10, %v1020_v35, %v1016_v33  ;;  %v1057_v9 = vand.u32 2147483647, %v3444_v13  ;;  %v1059_v52 = vand.u32 2147483648, %v3444_v13  ;;  %v1052_v36 = vadd.f32 %v3475_v19, %v1051_v54  ;;  %vm3540_vm13 = vmor %vm1053_vm11, %vm1054_vm12  ;;  %v4311_v35 = vld [vmem:[#allocation19_spill] sm:$0xff] }
 0x158   : > { %v1090_v39 = vsub.f32 1.0, %v1089_v55  ;;  %v1036_v56 = vadd.f32 1.1283791, %v1035_v57  ;;  %v1074_v1 = vadd.f32 0.18741608, %v1073_v27  ;;  %v400_v17 = vmul.f32 0.5, %v4306_v53 }
 0x159   : > { %v3538_v3 = vpop.eup %2429  ;;  %v1112_v28 = vadd.f32 0.05243302, %v1111_v62  ;;  %v1022_v58 = vmul.f32 %v1021_v45, %v997_v18  ;;  %v1198_v7 = vadd.f32 1.0, %v2317_v51  ;;  %vm1058_vm14 = vcmp.eq.f32.partialorder %v1057_v9, 8.507059e+37  ;;  %v4312_v45 = vld [vmem:[#allocation13_spill] sm:$0xff] }
 0x15a   : > { %2335 = vmatmul.msk.f32.gmra.mxu2 %vm1235_vm15, %v1216_v61  ;;  %v1310_v30 = vpop.f32.mrf.mxu1  ;;  %v1060_v32 = vor.u32 1.1754944e-38, %v1059_v52  ;;  %v1056_v49 = vsel %vm3540_vm13, %v3475_v19, %v1052_v36  ;;  %v1091_v24 = vmul.f32 %v3509_v48, %v1090_v39  ;;  %v1129_v6 = vmul.f32 %v3538_v3, %v3504_v16 }
 0x15b   : > { %v3546_v13 = vadd.f32 %v3532_v14, %v1310_v30  ;;  %v1037_v25 = vmul.f32 %v1036_v56, %v4307_v26  ;;  %v1075_v40 = vmul.f32 %v1074_v1, %v3211_v37  ;;  %vm1093_vm5 = vweird.f32 %v3471_v60 }
 0x15c   : > { %v1113_v23 = vmul.f32 %v1112_v28, %v3333_v22  ;;  %vm1094_vm1 = vweird.f32 %v3509_v48  ;;  %v1217_v0 = vmul.f32 %v1198_v7, %v400_v17  ;;  %v2318_v19 = vclamps-f32 %v1022_v58, 1.0 }
 0x15d   : > { %v3555_v63 = vmul.f32 0.70710677, %v3546_v13  ;;  %v1061_v20 = vsel %vm1058_vm14, %v1060_v32, %v1056_v49  ;;  %v1097_v34 = vand.u32 2147483647, %v3471_v60  ;;  %v1099_v15 = vand.u32 2147483648, %v3471_v60  ;;  %vm3573_vm2 = vmor %vm1093_vm5, %vm1094_vm1 }
 0x15e   : > { %v1092_v42 = vadd.f32 %v3509_v48, %v1091_v24  ;;  %v1130_v31 = vsub.f32 1.0, %v1129_v6  ;;  %v401_v21 = vmul.f32 0.5, %v4308_v10  ;;  %v1076_v11 = vadd.f32 1.1283791, %v1075_v40  ;;  %v4313_v24 = vld [vmem:[#allocation18_spill] sm:$0xff] }
 0x15f   : > { %v1405_v12 = vmul.f32 %v3555_v63, %v3555_v63  ;;  %v1114_v59 = vadd.f32 0.18741608, %v1113_v23  ;;  %v1062_v4 = vmul.f32 %v1061_v20, %v1037_v25  ;;  %v1199_v46 = vadd.f32 1.0, %v2318_v19 }
 0x160   : > { %vm1098_vm3 = vcmp.eq.f32.partialorder %v1097_v34, 8.507059e+37  ;;  %v1100_v2 = vor.u32 1.1754944e-38, %v1099_v15  ;;  %v1096_v5 = vsel %vm3573_vm2, %v3509_v48, %v1092_v42  ;;  %v1131_v50 = vmul.f32 %v3538_v3, %v1130_v31  ;;  %v4314_v31 = vld [vmem:[#allocation22_spill] sm:$0xff] }
 0x161   : > { %v3568_v37 = vmin.f32 %v1405_v12, 16.0  ;;  %v1077_v33 = vmul.f32 %v1076_v11, %v4311_v35  ;;  %v1115_v54 = vmul.f32 %v1114_v59, %v3333_v22  ;;  %vm1133_vm4 = vweird.f32 %v3504_v16 }
 0x162   : > { %2336 = vmatmul.msk.f32.gmra.mxu2 %vm1235_vm15, %v1217_v0  ;;  %vm1134_vm6 = vweird.f32 %v3538_v3  ;;  %v1218_v55 = vmul.f32 %v1199_v46, %v401_v21  ;;  %v2319_v41 = vclamps-f32 %v1062_v4, 1.0  ;;  %v1101_v27 = vsel %vm1098_vm3, %v1100_v2, %v1096_v5 }
 0x163   : > { %v1407_v44 = vmul.f32 2.1237322e-06, %v3568_v37  ;;  %v1418_v47 = vmul.f32 3.8918573e-05, %v3568_v37  ;;  %v1139_v48 = vand.u32 2147483648, %v3504_v16  ;;  %v1132_v62 = vadd.f32 %v3538_v3, %v1131_v50  ;;  %vm1135_vm7 = vmor %vm1133_vm4, %vm1134_vm6 }
 0x164   : > { %v1137_v61 = vand.u32 2147483647, %v3504_v16  ;;  %v402_v9 = vmul.f32 0.5, %v4312_v45  ;;  %v1102_v52 = vmul.f32 %v1101_v27, %v1077_v33  ;;  %v1116_v36 = vadd.f32 1.1283791, %v1115_v54 }
 0x165   : > { %v1408_v60 = vadd.f32 0.00028619796, %v1407_v44  ;;  %v1419_v38 = vadd.f32 0.001143296, %v1418_v47  ;;  %v1200_v39 = vadd.f32 1.0, %v2319_v41  ;;  %v1140_v8 = vor.u32 1.1754944e-38, %v1139_v48 }
 0x166   : > { %v1136_v1 = vsel %vm1135_vm7, %v3538_v3, %v1132_v62  ;;  %vm1138_vm8 = vcmp.eq.f32.partialorder %v1137_v61, 8.507059e+37  ;;  %v1117_v16 = vmul.f32 %v1116_v36, %v3267_v29  ;;  %v2320_v58 = vclamps-f32 %v1102_v52, 1.0 }
 0x167   : > { %v1409_v18 = vmul.f32 %v1408_v60, %v3568_v37  ;;  %v1420_v57 = vmul.f32 %v1419_v38, %v3568_v37  ;;  %v1219_v53 = vmul.f32 %v1200_v39, %v402_v9  ;;  %v1141_v7 = vsel %vm1138_vm8, %v1140_v8, %v1136_v1 }
 0x168   : > { %v403_v6 = vmul.f32 0.5, %v4313_v24  ;;  %v1142_v26 = vmul.f32 %v1141_v7, %v1117_v16  ;;  %v1201_v25 = vadd.f32 1.0, %v2320_v58  ;;  %v404_v10 = vmul.f32 0.5, %v4314_v31 }
 0x169   : > { %v1410_v22 = vadd.f32 0.0036580483, %v1409_v18  ;;  %v1421_v51 = vadd.f32 0.014752088, %v1420_v57 }
 0x16a   : > { %2337 = vmatmul.msk.f32.gmra.mxu2 %vm1235_vm15, %v1218_v55  ;;  %v1220_v12 = vmul.f32 %v1201_v25, %v403_v6  ;;  %v2321_v20 = vclamps-f32 %v1142_v26, 1.0 }
 0x16b   : > { %v1422_v56 = vmul.f32 %v1421_v51, %v3568_v37  ;;  %v1411_v28 = vmul.f32 %v1410_v22, %v3568_v37 }
 0x16c   : > { %v1202_v21 = vadd.f32 1.0, %v2321_v20 }
 0x16d   : > { %v1423_v30 = vadd.f32 0.112945676, %v1422_v56  ;;  %v1412_v32 = vadd.f32 0.05243302, %v1411_v28  ;;  %v1367_v56 = vmul.f32 0.5, %v3546_v13 }
 0x16e   : > { %v1221_v2 = vmul.f32 %v1202_v21, %v404_v10 }
 0x16f   : > { %v1424_v17 = vmul.f32 %v1423_v30, %v3568_v37  ;;  %v1413_v29 = vmul.f32 %v1412_v32, %v3568_v37 }
 0x171   : > { %v1425_v49 = vadd.f32 0.4994258, %v1424_v17  ;;  %v1414_v15 = vadd.f32 0.18741608, %v1413_v29 }
 0x172   : > { %2338 = vmatmul.msk.f32.gmra.mxu2 %vm1235_vm15, %v1219_v53 }
 0x173   : > { %v1426_v3 = vmul.f32 %v1425_v49, %v3568_v37  ;;  %v1313_v40 = vpop.f32.mrf.mxu1  ;;  %v1415_v4 = vmul.f32 %v1414_v15, %v3568_v37 }
 0x174   : > { %v3603_v23 = vadd.f32 %v3532_v14, %v1313_v40 }
 0x175   : > { %v1427_v0 = vadd.f32 1.0, %v1426_v3  ;;  %v1416_v38 = vadd.f32 1.1283791, %v1415_v4 }
 0x176   : > { %v3607_v19 = vmul.f32 0.70710677, %v3603_v23 }
 0x177   : > { %2431 = vrcp.f32 %v1427_v0  ;;  %v1437_v35 = vand.u32 2147483647, %v1427_v0  ;;  %v1439_v33 = vand.u32 2147483648, %v1427_v0  ;;  %vm1433_vm10 = vweird.f32 %v1427_v0 }
 0x178   : > { %v1445_v34 = vmul.f32 %v3607_v19, %v3607_v19  ;;  %v1417_v37 = vmul.f32 %v1416_v38, %v3555_v63 }
 0x179   : > { %v1440_v27 = vor.u32 1.1754944e-38, %v1439_v33  ;;  %vm1438_vm12 = vcmp.eq.f32.partialorder %v1437_v35, 8.507059e+37 }
 0x17a   : > { %2339 = vmatmul.msk.f32.gmra.mxu2 %vm1235_vm15, %v1220_v12  ;;  %v1446_v42 = vmin.f32 %v1445_v34, 16.0 }
 0x17c   : > { %v1447_v11 = vmul.f32 2.1237322e-06, %v1446_v42  ;;  %v1458_v43 = vmul.f32 3.8918573e-05, %v1446_v42 }
 0x17d   : > { %v2432_v59 = vpop.eup %2431 }
 0x17e   : > { %v1429_v46 = vmul.f32 %v2432_v59, %v1427_v0  ;;  %v1448_v44 = vadd.f32 0.00028619796, %v1447_v11  ;;  %v1459_v47 = vadd.f32 0.001143296, %v1458_v43  ;;  %vm1434_vm9 = vweird.f32 %v2432_v59 }
 0x17f   : > { %vm1435_vm11 = vmor %vm1433_vm10, %vm1434_vm9 }
 0x180   : > { %v1430_v5 = vsub.f32 1.0, %v1429_v46  ;;  %v1449_v50 = vmul.f32 %v1448_v44, %v1446_v42  ;;  %v1460_v60 = vmul.f32 %v1459_v47, %v1446_v42 }
 0x182   : > { %2340 = vmatmul.msk.f32.gmra.mxu2 %vm1235_vm15, %v1221_v2  ;;  %v1431_v54 = vmul.f32 %v2432_v59, %v1430_v5  ;;  %v1450_v55 = vadd.f32 0.0036580483, %v1449_v50  ;;  %v1461_v41 = vadd.f32 0.014752088, %v1460_v60 }
 0x184   : > { %v1432_v18 = vadd.f32 %v2432_v59, %v1431_v54  ;;  %v1462_v57 = vmul.f32 %v1461_v41, %v1446_v42  ;;  %v1451_v62 = vmul.f32 %v1450_v55, %v1446_v42 }
 0x186   : > { %v1436_v48 = vsel %vm1435_vm11, %v2432_v59, %v1432_v18  ;;  %v1463_v61 = vadd.f32 0.112945676, %v1462_v57  ;;  %v1452_v52 = vadd.f32 0.05243302, %v1451_v62 }
 0x187   : > { %v1441_v22 = vsel %vm1438_vm12, %v1440_v27, %v1436_v48  ;;  %v1368_v48 = vmul.f32 0.5, %v3603_v23 }
 0x188   : > { %v1442_v51 = vmul.f32 %v1441_v22, %v1417_v37  ;;  %v1464_v45 = vmul.f32 %v1463_v61, %v1446_v42  ;;  %v1453_v30 = vmul.f32 %v1452_v52, %v1446_v42 }
 0x18a   : > { %v2342_v9 = vclamps-f32 %v1442_v51, 1.0  ;;  %v1465_v36 = vadd.f32 0.4994258, %v1464_v45  ;;  %v1454_v17 = vadd.f32 0.18741608, %v1453_v30 }
 0x18b   : > { %v1316_v39 = vpop.f32.mrf.mxu1 }
 0x18c   : > { %v2165_v8 = vadd.f32 1.0, %v2342_v9  ;;  %v1466_v1 = vmul.f32 %v1465_v36, %v1446_v42  ;;  %v3618_v63 = vadd.f32 %v3532_v14, %v1316_v39  ;;  %v1455_v24 = vmul.f32 %v1454_v17, %v1446_v42 }
 0x18e   : > { %v2184_v28 = vmul.f32 %v2165_v8, %v1367_v56  ;;  %v1467_v16 = vadd.f32 1.0, %v1466_v1  ;;  %v3628_v53 = vmul.f32 0.70710677, %v3618_v63  ;;  %v1456_v12 = vadd.f32 1.1283791, %v1455_v24 }
 0x190   : > { %2203 = vst.msk [vmem:[%s3625_s10] sm:$0xff] %vm255_vm0, %v2184_v28  ;;  %2433 = vrcp.f32 %v1467_v16  ;;  %v1485_v13 = vmul.f32 %v3628_v53, %v3628_v53  ;;  %v1477_v20 = vand.u32 2147483647, %v1467_v16  ;;  %v1479_v34 = vand.u32 2147483648, %v1467_v16 }
 0x191   : > { %vm1473_vm13 = vweird.f32 %v1467_v16  ;;  %v1457_v44 = vmul.f32 %v1456_v12, %v3607_v19 }
 0x192   : > { %v3634_v58 = vmin.f32 %v1485_v13, 16.0  ;;  %v1480_v4 = vor.u32 1.1754944e-38, %v1479_v34  ;;  %vm1478_vm5 = vcmp.eq.f32.partialorder %v1477_v20, 8.507059e+37 }
 0x194   : > { %v1487_v7 = vmul.f32 2.1237322e-06, %v3634_v58  ;;  %v1498_v32 = vmul.f32 3.8918573e-05, %v3634_v58 }
 0x196   : > { %v2434_v49 = vpop.eup %2433  ;;  %v1488_v26 = vadd.f32 0.00028619796, %v1487_v7  ;;  %v1499_v3 = vadd.f32 0.001143296, %v1498_v32 }
 0x197   : > { %v1469_v6 = vmul.f32 %v2434_v49, %v1467_v16  ;;  %vm1474_vm15 = vweird.f32 %v2434_v49 }
 0x198   : > { %v1489_v40 = vmul.f32 %v1488_v26, %v3634_v58  ;;  %v1500_v29 = vmul.f32 %v1499_v3, %v3634_v58  ;;  %vm1475_vm14 = vmor %vm1473_vm13, %vm1474_vm15 }
 0x199   : > { %v1470_v25 = vsub.f32 1.0, %v1469_v6  ;;  %v1319_v0 = vpop.f32.mrf.mxu1 }
 0x19a   : > { %v3641_v15 = vadd.f32 %v3532_v14, %v1319_v0  ;;  %v1490_v10 = vadd.f32 0.0036580483, %v1489_v40  ;;  %v1501_v21 = vadd.f32 0.014752088, %v1500_v29 }
 0x19b   : > { %v1471_v31 = vmul.f32 %v2434_v49, %v1470_v25 }
 0x19c   : > { %v3644_v42 = vmul.f32 0.70710677, %v3641_v15  ;;  %v1491_v43 = vmul.f32 %v1490_v10, %v3634_v58  ;;  %v1502_v59 = vmul.f32 %v1501_v21, %v3634_v58 }
 0x19d   : > { %v1472_v11 = vadd.f32 %v2434_v49, %v1471_v31 }
 0x19e   : > { %v1525_v46 = vmul.f32 %v3644_v42, %v3644_v42  ;;  %v1503_v2 = vadd.f32 0.112945676, %v1502_v59  ;;  %v1492_v50 = vadd.f32 0.05243302, %v1491_v43 }
 0x19f   : > { %v1476_v47 = vsel %vm1475_vm14, %v2434_v49, %v1472_v11 }
 0x1a0   : > { %v1481_v5 = vsel %vm1478_vm5, %v1480_v4, %v1476_v47  ;;  %v3651_v60 = vmin.f32 %v1525_v46, 16.0  ;;  %v1504_v35 = vmul.f32 %v1503_v2, %v3634_v58  ;;  %v1493_v57 = vmul.f32 %v1492_v50, %v3634_v58 }
 0x1a1   : > { %v1482_v38 = vmul.f32 %v1481_v5, %v1457_v44  ;;  %v1322_v33 = vpop.f32.mrf.mxu1 }
 0x1a2   : > { %v1527_v54 = vmul.f32 2.1237322e-06, %v3651_v60  ;;  %v1538_v55 = vmul.f32 3.8918573e-05, %v3651_v60  ;;  %v3657_v41 = vadd.f32 %v3532_v14, %v1322_v33  ;;  %v1505_v19 = vadd.f32 0.4994258, %v1504_v35 }
 0x1a3   : > { %v2343_v18 = vclamps-f32 %v1482_v38, 1.0  ;;  %v1494_v39 = vadd.f32 0.18741608, %v1493_v57 }
 0x1a4   : > { %v1528_v37 = vadd.f32 0.00028619796, %v1527_v54  ;;  %v1539_v27 = vadd.f32 0.001143296, %v1538_v55  ;;  %v1506_v61 = vmul.f32 %v1505_v19, %v3634_v58  ;;  %v3663_v22 = vmul.f32 0.70710677, %v3657_v41 }
 0x1a5   : > { %v2166_v62 = vadd.f32 1.0, %v2343_v18  ;;  %v1495_v13 = vmul.f32 %v1494_v39, %v3634_v58 }
 0x1a6   : > { %v1529_v51 = vmul.f32 %v1528_v37, %v3651_v60  ;;  %v1540_v45 = vmul.f32 %v1539_v27, %v3651_v60  ;;  %v1507_v52 = vadd.f32 1.0, %v1506_v61  ;;  %v1565_v36 = vmul.f32 %v3663_v22, %v3663_v22 }
 0x1a7   : > { %v2185_v9 = vmul.f32 %v2166_v62, %v1368_v48  ;;  %v1496_v29 = vadd.f32 1.1283791, %v1495_v13 }
 0x1a8   : > { %v1530_v56 = vadd.f32 0.0036580483, %v1529_v51  ;;  %v1541_v8 = vadd.f32 0.014752088, %v1540_v45  ;;  %2435 = vrcp.f32 %v1507_v52  ;;  %v3673_v30 = vmin.f32 %v1565_v36, 16.0 }
 0x1a9   : > { %2204 = vst.msk [vmem:[%s3625_s10 + $0x8] sm:$0xff] %vm255_vm0, %v2185_v9  ;;  %v1325_v23 = vpop.f32.mrf.mxu1  ;;  %v1517_v21 = vand.u32 2147483647, %v1507_v52  ;;  %v1519_v59 = vand.u32 2147483648, %v1507_v52  ;;  %v1497_v47 = vmul.f32 %v1496_v29, %v3628_v53  ;;  %vm1513_vm2 = vweird.f32 %v1507_v52 }
 0x1aa   : > { %v1531_v1 = vmul.f32 %v1530_v56, %v3651_v60  ;;  %v1542_v28 = vmul.f32 %v1541_v8, %v3651_v60  ;;  %v3676_v16 = vadd.f32 %v3532_v14, %v1325_v23  ;;  %v1567_v32 = vmul.f32 2.1237322e-06, %v3673_v30 }
 0x1ab   : > { %v1578_v49 = vmul.f32 3.8918573e-05, %v3673_v30  ;;  %vm1518_vm3 = vcmp.eq.f32.partialorder %v1517_v21, 8.507059e+37  ;;  %v1520_v55 = vor.u32 1.1754944e-38, %v1519_v59  ;;  %v1369_v8 = vmul.f32 0.5, %v3618_v63 }
 0x1ac   : > { %v1532_v17 = vadd.f32 0.05243302, %v1531_v1  ;;  %v1543_v7 = vadd.f32 0.112945676, %v1542_v28  ;;  %v3684_v26 = vmul.f32 0.70710677, %v3676_v16 }
 0x1ad   : > { %v1568_v25 = vadd.f32 0.00028619796, %v1567_v32  ;;  %v1579_v40 = vadd.f32 0.001143296, %v1578_v49 }
 0x1ae   : > { %v1533_v24 = vmul.f32 %v1532_v17, %v3651_v60  ;;  %v1544_v6 = vmul.f32 %v1543_v7, %v3651_v60  ;;  %v2436_v3 = vpop.eup %2435  ;;  %v1605_v34 = vmul.f32 %v3684_v26, %v3684_v26 }
 0x1af   : > { %v1509_v0 = vmul.f32 %v2436_v3, %v1507_v52  ;;  %v1569_v58 = vmul.f32 %v1568_v25, %v3673_v30  ;;  %v1580_v20 = vmul.f32 %v1579_v40, %v3673_v30  ;;  %vm1514_vm1 = vweird.f32 %v2436_v3 }
 0x1b0   : > { %v1545_v12 = vadd.f32 0.4994258, %v1544_v6  ;;  %v1534_v11 = vadd.f32 0.18741608, %v1533_v24  ;;  %v3691_v44 = vmin.f32 %v1605_v34, 16.0  ;;  %vm1515_vm4 = vmor %vm1513_vm2, %vm1514_vm1 }
 0x1b1   : > { %v1328_v31 = vpop.f32.mrf.mxu1  ;;  %v1510_v10 = vsub.f32 1.0, %v1509_v0  ;;  %v1570_v4 = vadd.f32 0.0036580483, %v1569_v58  ;;  %v1581_v46 = vadd.f32 0.014752088, %v1580_v20 }
 0x1b2   : > { %v1546_v43 = vmul.f32 %v1545_v12, %v3651_v60  ;;  %v1607_v35 = vmul.f32 2.1237322e-06, %v3691_v44  ;;  %v1618_v33 = vmul.f32 3.8918573e-05, %v3691_v44  ;;  %v1535_v53 = vmul.f32 %v1534_v11, %v3651_v60 }
 0x1b3   : > { %v1511_v2 = vmul.f32 %v2436_v3, %v1510_v10  ;;  %v1571_v50 = vmul.f32 %v1570_v4, %v3673_v30  ;;  %v1582_v38 = vmul.f32 %v1581_v46, %v3673_v30  ;;  %v3703_v19 = vadd.f32 %v3532_v14, %v1328_v31 }
 0x1b4   : > { %v3694_v5 = vadd.f32 1.0, %v1546_v43  ;;  %v1608_v27 = vadd.f32 0.00028619796, %v1607_v35  ;;  %v1619_v48 = vadd.f32 0.001143296, %v1618_v33 }
 0x1b5   : > { %v1512_v54 = vadd.f32 %v2436_v3, %v1511_v2  ;;  %v1572_v18 = vadd.f32 0.05243302, %v1571_v50  ;;  %v1583_v37 = vadd.f32 0.112945676, %v1582_v38  ;;  %v1536_v60 = vadd.f32 1.1283791, %v1535_v53 }
 0x1b6   : > { %2437 = vrcp.f32 %v3694_v5  ;;  %v1609_v9 = vmul.f32 %v1608_v27, %v3691_v44  ;;  %v1620_v52 = vmul.f32 %v1619_v48, %v3691_v44  ;;  %v3710_v39 = vmul.f32 0.70710677, %v3703_v19 }
 0x1b7   : > { %v1516_v57 = vsel %vm1515_vm4, %v2436_v3, %v1512_v54  ;;  %v1573_v61 = vmul.f32 %v1572_v18, %v3673_v30  ;;  %v1584_v45 = vmul.f32 %v1583_v37, %v3673_v30  ;;  %v1557_v25 = vand.u32 2147483647, %v3694_v5 }
 0x1b8   : > { %v1521_v62 = vsel %vm1518_vm3, %v1520_v55, %v1516_v57  ;;  %v1610_v28 = vadd.f32 0.0036580483, %v1609_v9  ;;  %v1621_v7 = vadd.f32 0.014752088, %v1620_v52  ;;  %v1645_v3 = vmul.f32 %v3710_v39, %v3710_v39 }
 0x1b9   : > { %v1522_v51 = vmul.f32 %v1521_v62, %v1497_v47  ;;  %v1331_v36 = vpop.f32.mrf.mxu1  ;;  %v1585_v1 = vadd.f32 0.4994258, %v1584_v45  ;;  %v1574_v17 = vadd.f32 0.18741608, %v1573_v61  ;;  %v1559_v40 = vand.u32 2147483648, %v3694_v5 }
 0x1ba   : > { %v3715_v32 = vadd.f32 %v3532_v14, %v1331_v36  ;;  %v1611_v6 = vmul.f32 %v1610_v28, %v3691_v44  ;;  %v1622_v29 = vmul.f32 %v1621_v7, %v3691_v44  ;;  %v3726_v20 = vmin.f32 %v1645_v3, 16.0 }
 0x1bb   : > { %v2344_v23 = vclamps-f32 %v1522_v51, 1.0  ;;  %v1586_v24 = vmul.f32 %v1585_v1, %v3673_v30  ;;  %v1537_v21 = vmul.f32 %v1536_v60, %v3644_v42  ;;  %vm1553_vm7 = vweird.f32 %v3694_v5 }
 0x1bc   : > { %v2438_v56 = vpop.eup %2437  ;;  %v1612_v58 = vadd.f32 0.05243302, %v1611_v6  ;;  %v1623_v31 = vadd.f32 0.112945676, %v1622_v29  ;;  %v3729_v10 = vmul.f32 0.70710677, %v3715_v32  ;;  %v1575_v11 = vmul.f32 %v1574_v17, %v3673_v30  ;;  %v1364_v6 = vpop.f32.mrf.mxu3 }
 0x1bd   : > { %v1549_v13 = vmul.f32 %v2438_v56, %v3694_v5  ;;  %v2167_v49 = vadd.f32 1.0, %v2344_v23  ;;  %v3724_v12 = vadd.f32 1.0, %v1586_v24  ;;  %vm1554_vm6 = vweird.f32 %v2438_v56 }
 0x1be   : > { %v1613_v59 = vmul.f32 %v1612_v58, %v3691_v44  ;;  %v1624_v4 = vmul.f32 %v1623_v31, %v3691_v44  ;;  %v1647_v46 = vmul.f32 2.1237322e-06, %v3726_v20  ;;  %vm1555_vm8 = vmor %vm1553_vm7, %vm1554_vm6  ;;  %vm1558_vm9 = vcmp.eq.f32.partialorder %v1557_v25, 8.507059e+37 }
 0x1bf   : > { %v1550_v63 = vsub.f32 1.0, %v1549_v13  ;;  %v2186_v0 = vmul.f32 %v2167_v49, %v1369_v8  ;;  %2439 = vrcp.f32 %v3724_v12  ;;  %v1560_v47 = vor.u32 1.1754944e-38, %v1559_v40 }
 0x1c0   : > { %v1658_v2 = vmul.f32 3.8918573e-05, %v3726_v20  ;;  %v1685_v42 = vmul.f32 %v3729_v10, %v3729_v10  ;;  %v1614_v50 = vadd.f32 0.18741608, %v1613_v59  ;;  %v1625_v30 = vadd.f32 0.4994258, %v1624_v4 }
 0x1c1   : > { %v1551_v34 = vmul.f32 %v2438_v56, %v1550_v63  ;;  %2205 = vst.msk [vmem:[%s3625_s10 + $0x10] sm:$0xff] %vm255_vm0, %v2186_v0  ;;  %v1648_v38 = vadd.f32 0.00028619796, %v1647_v46  ;;  %v1576_v33 = vadd.f32 1.1283791, %v1575_v11  ;;  %v1370_v53 = vmul.f32 0.5, %v3641_v15  ;;  %v1334_v36 = vpop.f32.mrf.mxu1 }
 0x1c2   : > { %v1659_v54 = vadd.f32 0.001143296, %v1658_v2  ;;  %v3743_v55 = vmin.f32 %v1685_v42, 16.0  ;;  %v1626_v57 = vmul.f32 %v1625_v30, %v3691_v44  ;;  %v3749_v48 = vmul.f32 0.5, %v3657_v41 }
 0x1c3   : > { %v1552_v43 = vadd.f32 %v2438_v56, %v1551_v34  ;;  %v1649_v37 = vmul.f32 %v1648_v38, %v3726_v20  ;;  %v1615_v62 = vmul.f32 %v1614_v50, %v3691_v44  ;;  %v1597_v15 = vand.u32 2147483647, %v3724_v12 }
 0x1c4   : > { %v1660_v61 = vmul.f32 %v1659_v54, %v3726_v20  ;;  %v1687_v51 = vmul.f32 2.1237322e-06, %v3743_v55  ;;  %v1698_v52 = vmul.f32 3.8918573e-05, %v3743_v55  ;;  %v1577_v60 = vmul.f32 %v1576_v33, %v3663_v22 }
 0x1c5   : > { %v1556_v5 = vsel %vm1555_vm8, %v2438_v56, %v1552_v43  ;;  %v2440_v27 = vpop.eup %2439  ;;  %v3758_v56 = vadd.f32 1.0, %v1626_v57  ;;  %v1650_v41 = vadd.f32 0.0036580483, %v1649_v37  ;;  %v1599_v1 = vand.u32 2147483648, %v3724_v12 }
 0x1c6   : > { %v1561_v35 = vsel %vm1558_vm9, %v1560_v47, %v1556_v5  ;;  %v1589_v9 = vmul.f32 %v2440_v27, %v3724_v12  ;;  %v1661_v8 = vadd.f32 0.014752088, %v1660_v61  ;;  %v1688_v28 = vadd.f32 0.00028619796, %v1687_v51 }
 0x1c7   : > { %v1562_v18 = vmul.f32 %v1561_v35, %v1537_v21  ;;  %vm1594_vm10 = vweird.f32 %v2440_v27  ;;  %v1616_v13 = vadd.f32 1.1283791, %v1615_v62  ;;  %2441 = vrcp.f32 %v3758_v56 }
 0x1c8   : > { %v1590_v44 = vsub.f32 1.0, %v1589_v9  ;;  %v3763_v17 = vadd.f32 %v3532_v14, %v1334_v36  ;;  %v1651_v22 = vmul.f32 %v1650_v41, %v3726_v20  ;;  %v1662_v24 = vmul.f32 %v1661_v8, %v3726_v20 }
 0x1c9   : > { %v2345_v45 = vclamps-f32 %v1562_v18, 1.0  ;;  %vm1593_vm11 = vweird.f32 %v3724_v12  ;;  %vm3768_vm12 = vcmp.eq.f32.partialorder %v1597_v15, 8.507059e+37  ;;  %v1689_v63 = vmul.f32 %v1688_v28, %v3743_v55 }
 0x1ca   : > { %v1591_v49 = vmul.f32 %v2440_v27, %v1590_v44  ;;  %v1699_v25 = vadd.f32 0.001143296, %v1698_v52  ;;  %v1600_v29 = vor.u32 1.1754944e-38, %v1599_v1  ;;  %v1652_v0 = vadd.f32 0.05243302, %v1651_v22  ;;  %vm1595_vm15 = vmor %vm1593_vm11, %vm1594_vm10  ;;  %v1337_v52 = vpop.f32.mrf.mxu2 }
 0x1cb   : > { %v2168_v23 = vadd.f32 1.0, %v2345_v45  ;;  %v1663_v58 = vadd.f32 0.112945676, %v1662_v24  ;;  %v1690_v34 = vadd.f32 0.0036580483, %v1689_v63  ;;  %v3781_v21 = vadd.f32 %v3532_v14, %v1364_v6 }
 0x1cc   : > { %v1592_v40 = vadd.f32 %v2440_v27, %v1591_v49  ;;  %v1700_v31 = vmul.f32 %v1699_v25, %v3743_v55  ;;  %v3778_v12 = vmul.f32 0.70710677, %v3763_v17  ;;  %v1617_v43 = vmul.f32 %v1616_v13, %v3684_v26 }
 0x1cd   : > { %v2187_v7 = vmul.f32 %v2168_v23, %v1370_v53  ;;  %v1653_v59 = vmul.f32 %v1652_v0, %v3726_v20  ;;  %v1664_v4 = vmul.f32 %v1663_v58, %v3726_v20  ;;  %v2442_v46 = vpop.eup %2441  ;;  %v1691_v2 = vmul.f32 %v1690_v34, %v3743_v55 }
 0x1ce   : > { %v1596_v11 = vsel %vm1595_vm15, %v2440_v27, %v1592_v40  ;;  %v1701_v42 = vadd.f32 0.014752088, %v1700_v31  ;;  %v1725_v5 = vmul.f32 %v3778_v12, %v3778_v12  ;;  %v1629_v30 = vmul.f32 %v2442_v46, %v3758_v56 }
 0x1cf   : > { %2206 = vst.msk [vmem:[%s3625_s10 + $0x18] sm:$0xff] %vm255_vm0, %v2187_v7  ;;  %v1601_v47 = vsel %vm3768_vm12, %v1600_v29, %v1596_v11  ;;  %vm1633_vm13 = vweird.f32 %v3758_v56  ;;  %v1639_v26 = vand.u32 2147483648, %v3758_v56  ;;  %v1665_v38 = vadd.f32 0.4994258, %v1664_v4 }
 0x1d0   : > { %v1602_v50 = vmul.f32 %v1601_v47, %v1577_v60  ;;  %v1692_v35 = vadd.f32 0.05243302, %v1691_v2  ;;  %v1702_v33 = vmul.f32 %v1701_v42, %v3743_v55  ;;  %v3795_v54 = vmin.f32 %v1725_v5, 16.0 }
 0x1d1   : > { %v1630_v18 = vsub.f32 1.0, %v1629_v30  ;;  %v1637_v57 = vand.u32 2147483647, %v3758_v56  ;;  %v1654_v37 = vadd.f32 0.18741608, %v1653_v59  ;;  %v1666_v27 = vmul.f32 %v1665_v38, %v3726_v20 }
 0x1d2   : > { %v2346_v53 = vclamps-f32 %v1602_v50, 1.0  ;;  %v1693_v62 = vmul.f32 %v1692_v35, %v3743_v55  ;;  %v1703_v61 = vadd.f32 0.112945676, %v1702_v33  ;;  %v1727_v51 = vmul.f32 2.1237322e-06, %v3795_v54 }
 0x1d3   : > { %v1631_v9 = vmul.f32 %v2442_v46, %v1630_v18  ;;  %vm1634_vm14 = vweird.f32 %v2442_v46  ;;  %v1738_v15 = vmul.f32 3.8918573e-05, %v3795_v54  ;;  %v1640_v36 = vor.u32 1.1754944e-38, %v1639_v26 }
 0x1d4   : > { %v2169_v45 = vadd.f32 1.0, %v2346_v53  ;;  %v3802_v60 = vadd.f32 1.0, %v1666_v27  ;;  %v1704_v41 = vmul.f32 %v1703_v61, %v3743_v55  ;;  %v1728_v8 = vadd.f32 0.00028619796, %v1727_v51  ;;  %vm1635_vm5 = vmor %vm1633_vm13, %vm1634_vm14  ;;  %v1340_v53 = vpop.f32.mrf.mxu2 }
 0x1d5   : > { %v1632_v44 = vadd.f32 %v2442_v46, %v1631_v9  ;;  %v1655_v1 = vmul.f32 %v1654_v37, %v3726_v20  ;;  %v1739_v28 = vadd.f32 0.001143296, %v1738_v15  ;;  %v1694_v13 = vadd.f32 0.18741608, %v1693_v62 }
 0x1d6   : > { %v2188_v23 = vmul.f32 %v2169_v45, %v3749_v48  ;;  %2443 = vrcp.f32 %v3802_v60  ;;  %v3811_v7 = vmul.f32 0.70710677, %v3781_v21  ;;  %v3814_v49 = vadd.f32 %v3532_v14, %v1337_v52 }
 0x1d7   : > { %v1636_v22 = vsel %vm1635_vm5, %v2442_v46, %v1632_v44  ;;  %vm1638_vm1 = vcmp.eq.f32.partialorder %v1637_v57, 8.507059e+37  ;;  %v1705_v48 = vadd.f32 0.4994258, %v1704_v41  ;;  %v1729_v20 = vmul.f32 %v1728_v8, %v3795_v54 }
 0x1d8   : > { %2207 = vst.msk [vmem:[%s3625_s10 + $0x20] sm:$0xff] %vm255_vm0, %v2188_v23  ;;  %v1372_v24 = vmul.f32 0.5, %v3676_v16  ;;  %v1641_v56 = vsel %vm1638_vm1, %v1640_v36, %v1636_v22  ;;  %v3821_v6 = vmul.f32 0.5, %v3703_v19  ;;  %v1740_v3 = vmul.f32 %v1739_v28, %v3795_v54 }
 0x1d9   : > { %v1642_v63 = vmul.f32 %v1641_v56, %v1617_v43  ;;  %v1656_v25 = vadd.f32 1.1283791, %v1655_v1  ;;  %v1706_v40 = vmul.f32 %v1705_v48, %v3743_v55  ;;  %v1730_v29 = vadd.f32 0.0036580483, %v1729_v20 }
 0x1da   : > { %v1695_v0 = vmul.f32 %v1694_v13, %v3743_v55  ;;  %v1741_v58 = vadd.f32 0.014752088, %v1740_v3  ;;  %v2125_v34 = vmul.f32 %v3811_v7, %v3811_v7  ;;  %v3829_v31 = vmul.f32 0.70710677, %v3814_v49 }
 0x1db   : > { %v2347_v16 = vclamps-f32 %v1642_v63, 1.0  ;;  %v3832_v19 = vmul.f32 0.5, %v3715_v32  ;;  %v3834_v11 = vadd.f32 1.0, %v1706_v40  ;;  %v1731_v43 = vmul.f32 %v1730_v29, %v3795_v54 }
 0x1dc   : > { %v2444_v59 = vpop.eup %2443  ;;  %v1677_v4 = vand.u32 2147483647, %v3802_v60  ;;  %v1679_v55 = vand.u32 2147483648, %v3802_v60  ;;  %v1742_v46 = vmul.f32 %v1741_v58, %v3795_v54  ;;  %v3840_v47 = vmin.f32 %v2125_v34, 16.0 }
 0x1dd   : > { %v2170_v2 = vadd.f32 1.0, %v2347_v16  ;;  %v1669_v42 = vmul.f32 %v2444_v59, %v3802_v60  ;;  %2445 = vrcp.f32 %v3834_v11  ;;  %v1765_v32 = vmul.f32 %v3829_v31, %v3829_v31 }
 0x1de   : > { %v1657_v5 = vmul.f32 %v1656_v25, %v3710_v39  ;;  %vm1673_vm2 = vweird.f32 %v3802_v60  ;;  %v1696_v50 = vadd.f32 1.1283791, %v1695_v0  ;;  %v1732_v30 = vadd.f32 0.05243302, %v1731_v43  ;;  %v1343_v43 = vpop.f32.mrf.mxu2 }
 0x1df   : > { %v2189_v26 = vmul.f32 %v2170_v2, %v1372_v24  ;;  %v1670_v38 = vsub.f32 1.0, %v1669_v42  ;;  %v1743_v35 = vadd.f32 0.112945676, %v1742_v46  ;;  %v2127_v33 = vmul.f32 2.1237322e-06, %v3840_v47 }
 0x1e0   : > { %vm1674_vm3 = vweird.f32 %v2444_v59  ;;  %vm3849_vm4 = vcmp.eq.f32.partialorder %v1677_v4, 8.507059e+37  ;;  %v1680_v57 = vor.u32 1.1754944e-38, %v1679_v55  ;;  %v2138_v37 = vmul.f32 3.8918573e-05, %v3840_v47 }
 0x1e1   : > { %2208 = vst.msk [vmem:[%s3625_s10 + $0x28] sm:$0xff] %vm255_vm0, %v2189_v26  ;;  %v1671_v39 = vmul.f32 %v2444_v59, %v1670_v38  ;;  %v1744_v27 = vmul.f32 %v1743_v35, %v3795_v54  ;;  %v2128_v62 = vadd.f32 0.00028619796, %v2127_v33  ;;  %v3857_v61 = vmin.f32 %v1765_v32, 16.0  ;;  %vm1675_vm6 = vmor %vm1673_vm2, %vm1674_vm3 }
 0x1e2   : > { %v1697_v51 = vmul.f32 %v1696_v50, %v3729_v10  ;;  %v1733_v45 = vmul.f32 %v1732_v30, %v3795_v54  ;;  %v2139_v9 = vadd.f32 0.001143296, %v2138_v37  ;;  %v3862_v15 = vadd.f32 %v3532_v14, %v1340_v53 }
 0x1e3   : > { %v2446_v52 = vpop.eup %2445  ;;  %v1672_v36 = vadd.f32 %v2444_v59, %v1671_v39  ;;  %v1745_v41 = vadd.f32 0.4994258, %v1744_v27  ;;  %v2129_v8 = vmul.f32 %v2128_v62, %v3840_v47  ;;  %v1767_v23 = vmul.f32 2.1237322e-06, %v3857_v61 }
 0x1e4   : > { %v1709_v44 = vmul.f32 %v2446_v52, %v3834_v11  ;;  %v1717_v10 = vand.u32 2147483647, %v3834_v11  ;;  %v1719_v1 = vand.u32 2147483648, %v3834_v11  ;;  %v2140_v14 = vmul.f32 %v2139_v9, %v3840_v47 }
 0x1e5   : > { %v1676_v28 = vsel %vm1675_vm6, %v2444_v59, %v1672_v36  ;;  %v1746_v13 = vmul.f32 %v1745_v41, %v3795_v54  ;;  %v2130_v22 = vadd.f32 0.0036580483, %v2129_v8  ;;  %v1768_v48 = vadd.f32 0.00028619796, %v1767_v23 }
 0x1e6   : > { %v1681_v20 = vsel %vm3849_vm4, %v1680_v57, %v1676_v28  ;;  %v1710_v24 = vsub.f32 1.0, %v1709_v44  ;;  %v1734_v56 = vadd.f32 0.18741608, %v1733_v45  ;;  %v2141_v60 = vadd.f32 0.014752088, %v2140_v14 }
 0x1e7   : > { %v1682_v3 = vmul.f32 %v1681_v20, %v1657_v5  ;;  %v3876_v63 = vadd.f32 1.0, %v1746_v13  ;;  %v2131_v25 = vmul.f32 %v2130_v22, %v3840_v47  ;;  %v1769_v40 = vmul.f32 %v1768_v48, %v3857_v61  ;;  %v3912_v45 = vld [vmem:[%s4199_s4] ss:$0 sm:$0xff]  ;;  %v1346_v48 = vpop.f32.mrf.mxu2 }
 0x1e8   : > { %v1711_v29 = vmul.f32 %v2446_v52, %v1710_v24  ;;  %vm1714_vm7 = vweird.f32 %v2446_v52  ;;  %v2142_v0 = vmul.f32 %v2141_v60, %v3840_v47  ;;  %v1778_v58 = vmul.f32 3.8918573e-05, %v3857_v61 }
 0x1e9   : > { %v2348_v34 = vclamps-f32 %v1682_v3, 1.0  ;;  %vm1713_vm8 = vweird.f32 %v3834_v11  ;;  %vm3883_vm9 = vcmp.eq.f32.partialorder %v1717_v10, 8.507059e+37  ;;  %2447 = vrcp.f32 %v3876_v63 }
 0x1ea   : > { %v1712_v59 = vadd.f32 %v2446_v52, %v1711_v29  ;;  %v2132_v4 = vadd.f32 0.05243302, %v2131_v25  ;;  %v2143_v55 = vadd.f32 0.112945676, %v2142_v0  ;;  %v3889_v46 = vmul.f32 0.70710677, %v3862_v15  ;;  %vm1715_vm10 = vmor %vm1713_vm8, %vm1714_vm7 }
 0x1eb   : > { %v2171_v2 = vadd.f32 1.0, %v2348_v34  ;;  %v1720_v42 = vor.u32 1.1754944e-38, %v1719_v1  ;;  %v1770_v32 = vadd.f32 0.0036580483, %v1769_v40  ;;  %v1779_v5 = vadd.f32 0.001143296, %v1778_v58 }
 0x1ec   : > { %v1716_v11 = vsel %vm1715_vm10, %v2446_v52, %v1712_v59  ;;  %v1735_v50 = vmul.f32 %v1734_v56, %v3795_v54  ;;  %v2133_v30 = vmul.f32 %v2132_v4, %v3840_v47  ;;  %v2144_v26 = vmul.f32 %v2143_v55, %v3840_v47 }
 0x1ed   : > { %v2190_v38 = vmul.f32 %v2171_v2, %v3821_v6  ;;  %v1721_v35 = vsel %vm3883_vm9, %v1720_v42, %v1716_v11  ;;  %v1771_v33 = vmul.f32 %v1770_v32, %v3857_v61  ;;  %v1780_v53 = vmul.f32 %v1779_v5, %v3857_v61 }
 0x1ee   : > { %v1722_v18 = vmul.f32 %v1721_v35, %v1697_v51  ;;  %v2134_v57 = vadd.f32 0.18741608, %v2133_v30  ;;  %v2145_v37 = vadd.f32 0.4994258, %v2144_v26  ;;  %v1805_v39 = vmul.f32 %v3889_v46, %v3889_v46 }
 0x1ef   : > { %v2448_v54 = vpop.eup %2447  ;;  %2209 = vst.msk [vmem:[%s3625_s10 + $0x30] sm:$0xff] %vm255_vm0, %v2190_v38  ;;  %v3904_v27 = vmul.f32 0.5, %v3763_v17  ;;  %v3907_v6 = vmul.f32 0.5, %v3781_v21  ;;  %v1781_v62 = vadd.f32 0.014752088, %v1780_v53  ;;  %v3915_v51 = vadd.f32 %v3912_v45, %v1343_v43 }
 0x1f0   : > { %v2349_v9 = vclamps-f32 %v1722_v18, 1.0  ;;  %v1736_v52 = vadd.f32 1.1283791, %v1735_v50  ;;  %v1749_v36 = vmul.f32 %v2448_v54, %v3876_v63  ;;  %v1772_v41 = vadd.f32 0.05243302, %v1771_v33 }
 0x1f1   : > { %v2135_v17 = vmul.f32 %v2134_v57, %v3840_v47  ;;  %v2146_v8 = vmul.f32 %v2145_v37, %v3840_v47  ;;  %v1782_v21 = vmul.f32 %v1781_v62, %v3857_v61  ;;  %v3921_v23 = vmin.f32 %v1805_v39, 16.0 }
 0x1f2   : > { %v2172_v44 = vadd.f32 1.0, %v2349_v9  ;;  %v1750_v10 = vsub.f32 1.0, %v1749_v36  ;;  %v1757_v1 = vand.u32 2147483647, %v3876_v63  ;;  %v1759_v14 = vand.u32 2147483648, %v3876_v63 }
 0x1f3   : > { %vm1754_vm11 = vweird.f32 %v2448_v54  ;;  %v3925_v28 = vadd.f32 1.0, %v2146_v8  ;;  %v1783_v13 = vadd.f32 0.112945676, %v1782_v21  ;;  %v3928_v22 = vmul.f32 0.70710677, %v3915_v51 }
 0x1f4   : > { %v2191_v47 = vmul.f32 %v2172_v44, %v3832_v19  ;;  %v1751_v20 = vmul.f32 %v2448_v54, %v1750_v10  ;;  %v1773_v24 = vmul.f32 %v1772_v41, %v3857_v61  ;;  %v1807_v56 = vmul.f32 2.1237322e-06, %v3921_v23 }
 0x1f5   : > { %v1737_v60 = vmul.f32 %v1736_v52, %v3778_v12  ;;  %vm1753_vm12 = vweird.f32 %v3876_v63  ;;  %v2136_v3 = vadd.f32 1.1283791, %v2135_v17  ;;  %2449 = vrcp.f32 %v3925_v28 }
 0x1f6   : > { %2210 = vst.msk [vmem:[%s3625_s10 + $0x38] sm:$0xff] %vm255_vm0, %v2191_v47  ;;  %v1752_v25 = vadd.f32 %v2448_v54, %v1751_v20  ;;  %v1784_v40 = vmul.f32 %v1783_v13, %v3857_v61  ;;  %v1808_v29 = vadd.f32 0.00028619796, %v1807_v56  ;;  %v3940_v19 = vadd.f32 %v3912_v45, %v1346_v48  ;;  %vm1755_vm15 = vmor %vm1753_vm12, %vm1754_vm11 }
 0x1f7   : > { %vm1758_vm13 = vcmp.eq.f32.partialorder %v1757_v1, 8.507059e+37  ;;  %v1760_v0 = vor.u32 1.1754944e-38, %v1759_v14  ;;  %v1818_v12 = vmul.f32 3.8918573e-05, %v3921_v23  ;;  %v1845_v63 = vmul.f32 %v3928_v22, %v3928_v22 }
 0x1f8   : > { %v1756_v58 = vsel %vm1755_vm15, %v2448_v54, %v1752_v25  ;;  %v1774_v34 = vadd.f32 0.18741608, %v1773_v24  ;;  %v1785_v16 = vadd.f32 0.4994258, %v1784_v40  ;;  %v1809_v43 = vmul.f32 %v1808_v29, %v3921_v23 }
 0x1f9   : > { %v1761_v59 = vsel %vm1758_vm13, %v1760_v0, %v1756_v58  ;;  %v2137_v4 = vmul.f32 %v2136_v3, %v3811_v7  ;;  %v1819_v55 = vadd.f32 0.001143296, %v1818_v12  ;;  %v3948_v2 = vmin.f32 %v1845_v63, 16.0 }
 0x1fa   : > { %v1762_v42 = vmul.f32 %v1761_v59, %v1737_v60  ;;  %v1786_v32 = vmul.f32 %v1785_v16, %v3857_v61  ;;  %v1810_v5 = vadd.f32 0.0036580483, %v1809_v43  ;;  %v3952_v11 = vmul.f32 0.70710677, %v3940_v19 }
 0x1fb   : > { %v2450_v50 = vpop.eup %2449  ;;  %v2157_v30 = vand.u32 2147483647, %v3925_v28  ;;  %v1820_v26 = vmul.f32 %v1819_v55, %v3921_v23  ;;  %v1847_v38 = vmul.f32 2.1237322e-06, %v3948_v2  ;;  %v1858_v35 = vmul.f32 3.8918573e-05, %v3948_v2 }
 0x1fc   : > { %v2350_v7 = vclamps-f32 %v1762_v42, 1.0  ;;  %v2149_v33 = vmul.f32 %v2450_v50, %v3925_v28  ;;  %v2159_v53 = vand.u32 2147483648, %v3925_v28  ;;  %v3960_v18 = vadd.f32 1.0, %v1786_v32 }
 0x1fd   : > { %v1811_v57 = vmul.f32 %v1810_v5, %v3921_v23  ;;  %v1821_v37 = vadd.f32 0.014752088, %v1820_v26  ;;  %v1848_v39 = vadd.f32 0.00028619796, %v1847_v38  ;;  %v1859_v54 = vadd.f32 0.001143296, %v1858_v35 }
 0x1fe   : > { %v2173_v62 = vadd.f32 1.0, %v2350_v7  ;;  %v2150_v9 = vsub.f32 1.0, %v2149_v33  ;;  %2451 = vrcp.f32 %v3960_v18  ;;  %v1885_v52 = vmul.f32 %v3952_v11, %v3952_v11 }
 0x1ff   : > { %vm2154_vm14 = vweird.f32 %v2450_v50  ;;  %v1775_v36 = vmul.f32 %v1774_v34, %v3857_v61  ;;  %v1812_v41 = vadd.f32 0.05243302, %v1811_v57  ;;  %v1822_v17 = vmul.f32 %v1821_v37, %v3921_v23 }
 0x200   : > { %v2192_v8 = vmul.f32 %v2173_v62, %v3904_v27  ;;  %v2151_v21 = vmul.f32 %v2450_v50, %v2150_v9  ;;  %v1849_v44 = vmul.f32 %v1848_v39, %v3948_v2  ;;  %v1860_v10 = vmul.f32 %v1859_v54, %v3948_v2  ;;  %v1349_v27 = vpop.f32.mrf.mxu2 }
 0x201   : > { %vm2153_vm5 = vweird.f32 %v3925_v28  ;;  %vm3972_vm1 = vcmp.eq.f32.partialorder %v2157_v30, 8.507059e+37  ;;  %v2160_v14 = vor.u32 1.1754944e-38, %v2159_v53  ;;  %v1823_v13 = vadd.f32 0.112945676, %v1822_v17 }
 0x202   : > { %2211 = vst.msk [vmem:[%s3625_s10 + $0x40] sm:$0xff] %vm255_vm0, %v2192_v8  ;;  %v2152_v61 = vadd.f32 %v2450_v50, %v2151_v21  ;;  %v1850_v48 = vadd.f32 0.0036580483, %v1849_v44  ;;  %v1861_v47 = vadd.f32 0.014752088, %v1860_v10  ;;  %v3978_v20 = vmin.f32 %v1885_v52, 16.0  ;;  %vm2155_vm2 = vmor %vm2153_vm5, %vm2154_vm14 }
 0x203   : > { %v1776_v24 = vadd.f32 1.1283791, %v1775_v36  ;;  %vm1793_vm3 = vweird.f32 %v3960_v18  ;;  %v1813_v28 = vmul.f32 %v1812_v41, %v3921_v23  ;;  %v1824_v56 = vmul.f32 %v1823_v13, %v3921_v23 }
 0x204   : > { %v2452_v60 = vpop.eup %2451  ;;  %v2156_v3 = vsel %vm2155_vm2, %v2450_v50, %v2152_v61  ;;  %v1851_v25 = vmul.f32 %v1850_v48, %v3948_v2  ;;  %v1862_v40 = vmul.f32 %v1861_v47, %v3948_v2  ;;  %v1887_v29 = vmul.f32 2.1237322e-06, %v3978_v20 }
 0x205   : > { %v2161_v0 = vsel %vm3972_vm1, %v2160_v14, %v2156_v3  ;;  %v1789_v12 = vmul.f32 %v2452_v60, %v3960_v18  ;;  %v1797_v63 = vand.u32 2147483647, %v3960_v18  ;;  %v1799_v58 = vand.u32 2147483648, %v3960_v18 }
 0x206   : > { %v2162_v34 = vmul.f32 %v2161_v0, %v2137_v4  ;;  %v1825_v16 = vadd.f32 0.4994258, %v1824_v56  ;;  %v1852_v43 = vadd.f32 0.05243302, %v1851_v25  ;;  %v1863_v59 = vadd.f32 0.112945676, %v1862_v40 }
 0x207   : > { %v1790_v55 = vsub.f32 1.0, %v1789_v12  ;;  %v1814_v42 = vadd.f32 0.18741608, %v1813_v28  ;;  %v1888_v32 = vadd.f32 0.00028619796, %v1887_v29  ;;  %v3993_v5 = vadd.f32 %v3912_v45, %v1349_v27 }
 0x208   : > { %v2360_v50 = vclamps-f32 %v2162_v34, 1.0  ;;  %v1826_v30 = vmul.f32 %v1825_v16, %v3921_v23  ;;  %v1853_v26 = vmul.f32 %v1852_v43, %v3948_v2  ;;  %v1864_v38 = vmul.f32 %v1863_v59, %v3948_v2  ;;  %v1352_v17 = vpop.f32.mrf.mxu2 }
 0x209   : > { %v1791_v35 = vmul.f32 %v2452_v60, %v1790_v55  ;;  %vm1794_vm4 = vweird.f32 %v2452_v60  ;;  %v1889_v4 = vmul.f32 %v1888_v32, %v3978_v20  ;;  %v1898_v7 = vmul.f32 3.8918573e-05, %v3978_v20 }
 0x20a   : > { %v2183_v33 = vadd.f32 1.0, %v2360_v50  ;;  %v4000_v53 = vadd.f32 1.0, %v1826_v30  ;;  %v1854_v57 = vadd.f32 0.18741608, %v1853_v26  ;;  %v1865_v37 = vadd.f32 0.4994258, %v1864_v38  ;;  %vm1795_vm6 = vmor %vm1793_vm3, %vm1794_vm4 }
 0x20b   : > { %v1792_v39 = vadd.f32 %v2452_v60, %v1791_v35  ;;  %v1815_v54 = vmul.f32 %v1814_v42, %v3921_v23  ;;  %v1890_v62 = vadd.f32 0.0036580483, %v1889_v4  ;;  %v1899_v9 = vadd.f32 0.001143296, %v1898_v7 }
 0x20c   : > { %v2202_v52 = vmul.f32 %v2183_v33, %v3907_v6  ;;  %v1800_v36 = vor.u32 1.1754944e-38, %v1799_v58  ;;  %2453 = vrcp.f32 %v4000_v53  ;;  %v4008_v41 = vmul.f32 0.70710677, %v3993_v5 }
 0x20d   : > { %v1777_v8 = vmul.f32 %v1776_v24, %v3829_v31  ;;  %v1796_v21 = vsel %vm1795_vm6, %v2452_v60, %v1792_v39  ;;  %vm1798_vm7 = vcmp.eq.f32.partialorder %v1797_v63, 8.507059e+37  ;;  %v1866_v23 = vmul.f32 %v1865_v37, %v3948_v2 }
 0x20e   : > { %2221 = vst.msk [vmem:[%s3625_s10 + $0x90] sm:$0xff] %vm255_vm0, %v2202_v52  ;;  %v1801_v44 = vsel %vm1798_vm7, %v1800_v36, %v1796_v21  ;;  %v1855_v6 = vmul.f32 %v1854_v57, %v3948_v2  ;;  %v1891_v18 = vmul.f32 %v1890_v62, %v3978_v20  ;;  %v1900_v10 = vmul.f32 %v1899_v9, %v3978_v20 }
 0x20f   : > { %v1802_v1 = vmul.f32 %v1801_v44, %v1777_v8  ;;  %v1816_v14 = vadd.f32 1.1283791, %v1815_v54  ;;  %v4017_v13 = vadd.f32 1.0, %v1866_v23  ;;  %v1837_v61 = vand.u32 2147483647, %v4000_v53 }
 0x210   : > { %v1839_v31 = vand.u32 2147483648, %v4000_v53  ;;  %v1901_v48 = vadd.f32 0.014752088, %v1900_v10  ;;  %v1925_v47 = vmul.f32 %v4008_v41, %v4008_v41  ;;  %v1376_v27 = vmul.f32 0.5, %v3814_v49  ;;  %v1355_v32 = vpop.f32.mrf.mxu2 }
 0x211   : > { %v2351_v24 = vclamps-f32 %v1802_v1, 1.0  ;;  %2455 = vrcp.f32 %v4017_v13  ;;  %v1856_v28 = vadd.f32 1.1283791, %v1855_v6  ;;  %v1892_v56 = vadd.f32 0.05243302, %v1891_v18 }
 0x212   : > { %v2454_v2 = vpop.eup %2453  ;;  %v1902_v60 = vmul.f32 %v1901_v48, %v3978_v20  ;;  %v4027_v3 = vadd.f32 %v3912_v45, %v1352_v17  ;;  %v1817_v40 = vmul.f32 %v1816_v14, %v3889_v46  ;;  %v4031_v0 = vmin.f32 %v1925_v47, 16.0 }
 0x213   : > { %v2174_v25 = vadd.f32 1.0, %v2351_v24  ;;  %v1829_v29 = vmul.f32 %v2454_v2, %v4000_v53  ;;  %vm1833_vm8 = vweird.f32 %v4000_v53  ;;  %vm4034_vm9 = vcmp.eq.f32.partialorder %v1837_v61, 8.507059e+37 }
 0x214   : > { %v1840_v12 = vor.u32 1.1754944e-38, %v1839_v31  ;;  %v1903_v63 = vadd.f32 0.112945676, %v1902_v60  ;;  %v1927_v16 = vmul.f32 2.1237322e-06, %v4031_v0  ;;  %v1857_v46 = vmul.f32 %v1856_v28, %v3928_v22 }
 0x215   : > { %v2193_v58 = vmul.f32 %v2174_v25, %v1376_v27  ;;  %v1830_v34 = vsub.f32 1.0, %v1829_v29  ;;  %v1938_v43 = vmul.f32 3.8918573e-05, %v4031_v0  ;;  %v1893_v59 = vmul.f32 %v1892_v56, %v3978_v20 }
 0x216   : > { %v1904_v55 = vmul.f32 %v1903_v63, %v3978_v20  ;;  %v4044_v42 = vmul.f32 0.70710677, %v4027_v3  ;;  %vm1834_vm10 = vweird.f32 %v2454_v2  ;;  %v1928_v26 = vadd.f32 0.00028619796, %v1927_v16 }
 0x217   : > { %v2456_v50 = vpop.eup %2455  ;;  %2212 = vst.msk [vmem:[%s3625_s10 + $0x48] sm:$0xff] %vm255_vm0, %v2193_v58  ;;  %v1831_v30 = vmul.f32 %v2454_v2, %v1830_v34  ;;  %v1939_v38 = vadd.f32 0.001143296, %v1938_v43  ;;  %v1877_v4 = vand.u32 2147483647, %v4017_v13  ;;  %v1879_v22 = vand.u32 2147483648, %v4017_v13  ;;  %vm1835_vm11 = vmor %vm1833_vm8, %vm1834_vm10 }
 0x218   : > { %v1869_v35 = vmul.f32 %v2456_v50, %v4017_v13  ;;  %v1905_v7 = vadd.f32 0.4994258, %v1904_v55  ;;  %v1929_v57 = vmul.f32 %v1928_v26, %v4031_v0  ;;  %v1965_v39 = vmul.f32 %v4044_v42, %v4044_v42  ;;  %v1358_v56 = vpop.f32.mrf.mxu2 }
 0x219   : > { %v1832_v33 = vadd.f32 %v2454_v2, %v1831_v30  ;;  %v1940_v37 = vmul.f32 %v1939_v38, %v4031_v0  ;;  %v1894_v62 = vadd.f32 0.18741608, %v1893_v59  ;;  %v4059_v52 = vadd.f32 %v3912_v45, %v1355_v32 }
 0x21a   : > { %v1870_v54 = vsub.f32 1.0, %v1869_v35  ;;  %v1906_v9 = vmul.f32 %v1905_v7, %v3978_v20  ;;  %v1930_v17 = vadd.f32 0.0036580483, %v1929_v57  ;;  %v4061_v21 = vmin.f32 %v1965_v39, 16.0 }
 0x21b   : > { %v1836_v36 = vsel %vm1835_vm11, %v2454_v2, %v1832_v33  ;;  %v1941_v8 = vadd.f32 0.014752088, %v1940_v37  ;;  %vm1874_vm12 = vweird.f32 %v2456_v50  ;;  %vm1873_vm15 = vweird.f32 %v4017_v13 }
 0x21c   : > { %v1841_v23 = vsel %vm4034_vm9, %v1840_v12, %v1836_v36  ;;  %v1871_v44 = vmul.f32 %v2456_v50, %v1870_v54  ;;  %v4065_v6 = vadd.f32 1.0, %v1906_v9  ;;  %v1931_v18 = vmul.f32 %v1930_v17, %v4031_v0  ;;  %vm1875_vm13 = vmor %vm1873_vm15, %vm1874_vm12 }
 0x21d   : > { %v1842_v53 = vmul.f32 %v1841_v23, %v1817_v40  ;;  %v1942_v10 = vmul.f32 %v1941_v8, %v4031_v0  ;;  %v1967_v1 = vmul.f32 2.1237322e-06, %v4061_v21  ;;  %v4073_v61 = vmul.f32 0.70710677, %v4059_v52 }
 0x21e   : > { %v1872_v14 = vadd.f32 %v2456_v50, %v1871_v44  ;;  %2457 = vrcp.f32 %v4065_v6  ;;  %v1880_v48 = vor.u32 1.1754944e-38, %v1879_v22  ;;  %v1932_v47 = vadd.f32 0.05243302, %v1931_v18 }
 0x21f   : > { %v2352_v31 = vclamps-f32 %v1842_v53, 1.0  ;;  %v1943_v27 = vadd.f32 0.112945676, %v1942_v10  ;;  %vm1878_vm14 = vcmp.eq.f32.partialorder %v1877_v4, 8.507059e+37  ;;  %v1968_v2 = vadd.f32 0.00028619796, %v1967_v1 }
 0x220   : > { %v1876_v24 = vsel %vm1875_vm13, %v2456_v50, %v1872_v14  ;;  %v1978_v28 = vmul.f32 3.8918573e-05, %v4061_v21  ;;  %v1377_v60 = vmul.f32 0.5, %v3862_v15  ;;  %v1895_v40 = vmul.f32 %v1894_v62, %v3978_v20  ;;  %v1361_v23 = vpop.f32.mrf.mxu2 }
 0x221   : > { %v2175_v25 = vadd.f32 1.0, %v2352_v31  ;;  %v1881_v13 = vsel %vm1878_vm14, %v1880_v48, %v1876_v24  ;;  %v1944_v49 = vmul.f32 %v1943_v27, %v4031_v0  ;;  %v1969_v12 = vmul.f32 %v1968_v2, %v4061_v21 }
 0x222   : > { %v1882_v29 = vmul.f32 %v1881_v13, %v1857_v46  ;;  %v1979_v63 = vadd.f32 0.001143296, %v1978_v28  ;;  %v1378_v34 = vmul.f32 0.5, %v3915_v51  ;;  %v1933_v16 = vmul.f32 %v1932_v47, %v4031_v0 }
 0x223   : > { %v2194_v58 = vmul.f32 %v2175_v25, %v1377_v60  ;;  %v2005_v43 = vmul.f32 %v4073_v61, %v4073_v61  ;;  %v1945_v55 = vadd.f32 0.4994258, %v1944_v49  ;;  %v1970_v32 = vadd.f32 0.0036580483, %v1969_v12 }
 0x224   : > { %v2458_v15 = vpop.eup %2457  ;;  %v2353_v59 = vclamps-f32 %v1882_v29, 1.0  ;;  %v1980_v20 = vmul.f32 %v1979_v63, %v4061_v21  ;;  %v1896_v46 = vadd.f32 1.1283791, %v1895_v40  ;;  %v1917_v30 = vand.u32 2147483647, %v4065_v6 }
 0x225   : > { %2213 = vst.msk [vmem:[%s3625_s10 + $0x50] sm:$0xff] %vm255_vm0, %v2194_v58  ;;  %v1909_v50 = vmul.f32 %v2458_v15, %v4065_v6  ;;  %v4089_v26 = vmin.f32 %v2005_v43, 16.0  ;;  %v1946_v38 = vmul.f32 %v1945_v55, %v4031_v0  ;;  %v1971_v35 = vmul.f32 %v1970_v32, %v4061_v21 }
 0x226   : > { %v2176_v51 = vadd.f32 1.0, %v2353_v59  ;;  %v1981_v4 = vadd.f32 0.014752088, %v1980_v20  ;;  %v1934_v7 = vadd.f32 0.18741608, %v1933_v16  ;;  %v4095_v57 = vadd.f32 %v3912_v45, %v1358_v56 }
 0x227   : > { %v1910_v22 = vsub.f32 1.0, %v1909_v50  ;;  %v2007_v33 = vmul.f32 2.1237322e-06, %v4089_v26  ;;  %v1919_v39 = vand.u32 2147483648, %v4065_v6  ;;  %v4098_v54 = vadd.f32 1.0, %v1946_v38 }
 0x228   : > { %v2195_v37 = vmul.f32 %v2176_v51, %v1378_v34  ;;  %v1982_v62 = vmul.f32 %v1981_v4, %v4061_v21  ;;  %vm1914_vm5 = vweird.f32 %v2458_v15  ;;  %v2018_v17 = vmul.f32 3.8918573e-05, %v4089_v26 }
 0x229   : > { %v1911_v9 = vmul.f32 %v2458_v15, %v1910_v22  ;;  %v2008_v36 = vadd.f32 0.00028619796, %v2007_v33  ;;  %vm1913_vm1 = vweird.f32 %v4065_v6  ;;  %2459 = vrcp.f32 %v4098_v54 }
 0x22a   : > { %2214 = vst.msk [vmem:[%s3625_s10 + $0x58] sm:$0xff] %vm255_vm0, %v2195_v37  ;;  %v1972_v8 = vadd.f32 0.05243302, %v1971_v35  ;;  %v1935_v53 = vmul.f32 %v1934_v7, %v4031_v0  ;;  %v1983_v18 = vadd.f32 0.112945676, %v1982_v62  ;;  %v1897_v1 = vmul.f32 %v1896_v46, %v3952_v11  ;;  %vm1915_vm2 = vmor %vm1913_vm1, %vm1914_vm5 }
 0x22b   : > { %v1912_v44 = vadd.f32 %v2458_v15, %v1911_v9  ;;  %v2009_v10 = vmul.f32 %v2008_v36, %v4089_v26  ;;  %v1920_v14 = vor.u32 1.1754944e-38, %v1919_v39  ;;  %v2019_v31 = vadd.f32 0.001143296, %v2018_v17 }
 0x22c   : > { %v4110_v48 = vmul.f32 0.70710677, %v4095_v57  ;;  %vm1918_vm3 = vcmp.eq.f32.partialorder %v1917_v30, 8.507059e+37  ;;  %v1984_v6 = vmul.f32 %v1983_v18, %v4061_v21  ;;  %v4114_v27 = vadd.f32 %v3912_v45, %v1361_v23 }
 0x22d   : > { %v1916_v47 = vsel %vm1915_vm2, %v2458_v15, %v1912_v44  ;;  %v1973_v0 = vmul.f32 %v1972_v8, %v4061_v21  ;;  %v2020_v2 = vmul.f32 %v2019_v31, %v4089_v26  ;;  %v1936_v56 = vadd.f32 1.1283791, %v1935_v53 }
 0x22e   : > { %v1921_v24 = vsel %vm1918_vm3, %v1920_v14, %v1916_v47  ;;  %v2045_v11 = vmul.f32 %v4110_v48, %v4110_v48  ;;  %v1985_v60 = vadd.f32 0.4994258, %v1984_v6  ;;  %v2010_v25 = vadd.f32 0.0036580483, %v2009_v10 }
 0x22f   : > { %v1922_v28 = vmul.f32 %v1921_v24, %v1897_v1  ;;  %v2460_v13 = vpop.eup %2459  ;;  %v1379_v40 = vmul.f32 0.5, %v3940_v19  ;;  %v1957_v29 = vand.u32 2147483647, %v4098_v54  ;;  %v2021_v49 = vadd.f32 0.014752088, %v2020_v2 }
 0x230   : > { %v4122_v45 = vmin.f32 %v2045_v11, 16.0  ;;  %v1949_v63 = vmul.f32 %v2460_v13, %v4098_v54  ;;  %v1959_v58 = vand.u32 2147483648, %v4098_v54  ;;  %v4127_v34 = vmul.f32 0.70710677, %v4114_v27 }
 0x231   : > { %v2354_v12 = vclamps-f32 %v1922_v28, 1.0  ;;  %v1974_v16 = vadd.f32 0.18741608, %v1973_v0  ;;  %v1986_v43 = vmul.f32 %v1985_v60, %v4061_v21  ;;  %v2022_v15 = vmul.f32 %v2021_v49, %v4089_v26 }
 0x232   : > { %v2047_v19 = vmul.f32 2.1237322e-06, %v4122_v45  ;;  %v1950_v55 = vsub.f32 1.0, %v1949_v63  ;;  %v2011_v32 = vmul.f32 %v2010_v25, %v4089_v26  ;;  %v2058_v20 = vmul.f32 3.8918573e-05, %v4122_v45 }
 0x233   : > { %v2177_v59 = vadd.f32 1.0, %v2354_v12  ;;  %vm1954_vm4 = vweird.f32 %v2460_v13  ;;  %v4134_v46 = vadd.f32 1.0, %v1986_v43  ;;  %v2023_v50 = vadd.f32 0.112945676, %v2022_v15 }
 0x234   : > { %v2048_v30 = vadd.f32 0.00028619796, %v2047_v19  ;;  %v1951_v38 = vmul.f32 %v2460_v13, %v1950_v55  ;;  %v2059_v35 = vadd.f32 0.001143296, %v2058_v20  ;;  %v2085_v4 = vmul.f32 %v4127_v34, %v4127_v34 }
 0x235   : > { %v2196_v51 = vmul.f32 %v2177_v59, %v1379_v40  ;;  %v1937_v22 = vmul.f32 %v1936_v56, %v4008_v41  ;;  %2461 = vrcp.f32 %v4134_v46  ;;  %vm1953_vm6 = vweird.f32 %v4098_v54 }
 0x236   : > { %v1952_v7 = vadd.f32 %v2460_v13, %v1951_v38  ;;  %vm1958_vm7 = vcmp.eq.f32.partialorder %v1957_v29, 8.507059e+37  ;;  %v2024_v33 = vmul.f32 %v2023_v50, %v4089_v26  ;;  %vm1955_vm8 = vmor %vm1953_vm6, %vm1954_vm4  ;;  %v1960_v37 = vor.u32 1.1754944e-38, %v1959_v58 }
 0x237   : > { %2215 = vst.msk [vmem:[%s3625_s10 + $0x60] sm:$0xff] %vm255_vm0, %v2196_v51  ;;  %v2049_v39 = vmul.f32 %v2048_v30, %v4122_v45  ;;  %v2060_v62 = vmul.f32 %v2059_v35, %v4122_v45  ;;  %v4147_v9 = vmin.f32 %v2085_v4, 16.0  ;;  %v1975_v36 = vmul.f32 %v1974_v16, %v4061_v21 }
 0x238   : > { %v1956_v41 = vsel %vm1955_vm8, %v2460_v13, %v1952_v7  ;;  %v2012_v17 = vadd.f32 0.05243302, %v2011_v32  ;;  %v2025_v8 = vadd.f32 0.4994258, %v2024_v33  ;;  %v1380_v24 = vmul.f32 0.5, %v3993_v5 }
 0x239   : > { %v1961_v23 = vsel %vm1958_vm7, %v1960_v37, %v1956_v41  ;;  %v2061_v44 = vadd.f32 0.014752088, %v2060_v62  ;;  %v2087_v54 = vmul.f32 2.1237322e-06, %v4147_v9  ;;  %v2098_v53 = vmul.f32 3.8918573e-05, %v4147_v9 }
 0x23a   : > { %v1962_v18 = vmul.f32 %v1961_v23, %v1937_v22  ;;  %v2026_v10 = vmul.f32 %v2025_v8, %v4089_v26  ;;  %v2050_v14 = vadd.f32 0.0036580483, %v2049_v39  ;;  %v1976_v2 = vadd.f32 1.1283791, %v1975_v36 }
 0x23b   : > { %v2462_v1 = vpop.eup %2461  ;;  %v2062_v31 = vmul.f32 %v2061_v44, %v4122_v45  ;;  %v2088_v47 = vadd.f32 0.00028619796, %v2087_v54  ;;  %v2099_v6 = vadd.f32 0.001143296, %v2098_v53  ;;  %v2013_v11 = vmul.f32 %v2012_v17, %v4089_v26 }
 0x23c   : > { %v2355_v21 = vclamps-f32 %v1962_v18, 1.0  ;;  %v1989_v0 = vmul.f32 %v2462_v1, %v4134_v46  ;;  %v2027_v28 = vadd.f32 1.0, %v2026_v10  ;;  %v1997_v13 = vand.u32 2147483647, %v4134_v46 }
 0x23d   : > { %v2063_v56 = vadd.f32 0.112945676, %v2062_v31  ;;  %v2100_v40 = vmul.f32 %v2099_v6, %v4147_v9  ;;  %v1999_v29 = vand.u32 2147483648, %v4134_v46  ;;  %v2051_v5 = vmul.f32 %v2050_v14, %v4122_v45 }
 0x23e   : > { %v2178_v60 = vadd.f32 1.0, %v2355_v21  ;;  %v1990_v25 = vsub.f32 1.0, %v1989_v0  ;;  %2463 = vrcp.f32 %v2027_v28  ;;  %v2089_v49 = vmul.f32 %v2088_v47, %v4147_v9 }
 0x23f   : > { %vm1994_vm9 = vweird.f32 %v2462_v1  ;;  %v2064_v58 = vmul.f32 %v2063_v56, %v4122_v45  ;;  %v2014_v16 = vadd.f32 0.18741608, %v2013_v11  ;;  %v2101_v43 = vadd.f32 0.014752088, %v2100_v40 }
 0x240   : > { %v2197_v12 = vmul.f32 %v2178_v60, %v1380_v24  ;;  %v1991_v63 = vmul.f32 %v2462_v1, %v1990_v25  ;;  %vm1993_vm10 = vweird.f32 %v4134_v46  ;;  %v2000_v59 = vor.u32 1.1754944e-38, %v1999_v29 }
 0x241   : > { %v2065_v19 = vadd.f32 0.4994258, %v2064_v58  ;;  %vm1995_vm11 = vmor %vm1993_vm10, %vm1994_vm9  ;;  %v2052_v55 = vadd.f32 0.05243302, %v2051_v5  ;;  %v2090_v32 = vadd.f32 0.0036580483, %v2089_v49  ;;  %v2102_v20 = vmul.f32 %v2101_v43, %v4147_v9 }
 0x242   : > { %2216 = vst.msk [vmem:[%s3625_s10 + $0x68] sm:$0xff] %vm255_vm0, %v2197_v12  ;;  %v1992_v15 = vadd.f32 %v2462_v1, %v1991_v63  ;;  %v1977_v50 = vmul.f32 %v1976_v2, %v4044_v42  ;;  %vm1998_vm12 = vcmp.eq.f32.partialorder %v1997_v13, 8.507059e+37  ;;  %v2015_v4 = vmul.f32 %v2014_v16, %v4089_v26 }
 0x243   : > { %v2066_v51 = vmul.f32 %v2065_v19, %v4122_v45  ;;  %v2103_v22 = vadd.f32 0.112945676, %v2102_v20  ;;  %v2053_v33 = vmul.f32 %v2052_v55, %v4122_v45  ;;  %v2091_v39 = vmul.f32 %v2090_v32, %v4147_v9 }
 0x244   : > { %v1996_v30 = vsel %vm1995_vm11, %v2462_v1, %v1992_v15  ;;  %v2464_v38 = vpop.eup %2463  ;;  %v1381_v42 = vmul.f32 0.5, %v4027_v3  ;;  %v2016_v17 = vadd.f32 1.1283791, %v2015_v4  ;;  %v2037_v8 = vand.u32 2147483647, %v2027_v28 }
 0x245   : > { %v2001_v35 = vsel %vm1998_vm12, %v2000_v59, %v1996_v30  ;;  %v2029_v46 = vmul.f32 %v2464_v38, %v2027_v28  ;;  %v2067_v37 = vadd.f32 1.0, %v2066_v51  ;;  %v2104_v62 = vmul.f32 %v2103_v22, %v4147_v9 }
 0x246   : > { %v2002_v7 = vmul.f32 %v2001_v35, %v1977_v50  ;;  %v2039_v23 = vand.u32 2147483648, %v2027_v28  ;;  %vm2034_vm15 = vweird.f32 %v2464_v38  ;;  %v2054_v53 = vadd.f32 0.18741608, %v2053_v33 }
 0x247   : > { %v2030_v36 = vsub.f32 1.0, %v2029_v46  ;;  %2465 = vrcp.f32 %v2067_v37  ;;  %v2105_v54 = vadd.f32 0.4994258, %v2104_v62  ;;  %v2092_v18 = vadd.f32 0.05243302, %v2091_v39 }
 0x248   : > { %v2356_v41 = vclamps-f32 %v2002_v7, 1.0  ;;  %vm2033_vm13 = vweird.f32 %v2027_v28  ;;  %v2040_v3 = vor.u32 1.1754944e-38, %v2039_v23  ;;  %v2017_v31 = vmul.f32 %v2016_v17, %v4073_v61 }
 0x249   : > { %v2031_v44 = vmul.f32 %v2464_v38, %v2030_v36  ;;  %v2106_v14 = vmul.f32 %v2105_v54, %v4147_v9  ;;  %vm2035_vm14 = vmor %vm2033_vm13, %vm2034_vm15  ;;  %vm2038_vm5 = vcmp.eq.f32.partialorder %v2037_v8, 8.507059e+37  ;;  %v2055_v0 = vmul.f32 %v2054_v53, %v4122_v45 }
 0x24a   : > { %v2179_v26 = vadd.f32 1.0, %v2356_v41  ;;  %v2093_v2 = vmul.f32 %v2092_v18, %v4147_v9  ;;  %v1382_v25 = vmul.f32 0.5, %v4059_v52  ;;  %v2079_v40 = vand.u32 2147483648, %v2067_v37 }
 0x24b   : > { %v2032_v1 = vadd.f32 %v2464_v38, %v2031_v44  ;;  %v2107_v6 = vadd.f32 1.0, %v2106_v14  ;;  %v2056_v13 = vadd.f32 1.1283791, %v2055_v0  ;;  %v2077_v49 = vand.u32 2147483647, %v2067_v37 }
 0x24c   : > { %v2198_v10 = vmul.f32 %v2179_v26, %v1381_v42  ;;  %v2094_v61 = vadd.f32 0.18741608, %v2093_v2  ;;  %vm2073_vm2 = vweird.f32 %v2067_v37  ;;  %v2080_v58 = vor.u32 1.1754944e-38, %v2079_v40 }
 0x24d   : > { %v2036_v47 = vsel %vm2035_vm14, %v2464_v38, %v2032_v1  ;;  %v2466_v24 = vpop.eup %2465  ;;  %2467 = vrcp.f32 %v2107_v6  ;;  %v2057_v43 = vmul.f32 %v2056_v13, %v4110_v48  ;;  %vm2078_vm4 = vcmp.eq.f32.partialorder %v2077_v49, 8.507059e+37 }
 0x24e   : > { %2217 = vst.msk [vmem:[%s3625_s10 + $0x70] sm:$0xff] %vm255_vm0, %v2198_v10  ;;  %v2041_v21 = vsel %vm2038_vm5, %v2040_v3, %v2036_v47  ;;  %v2069_v56 = vmul.f32 %v2466_v24, %v2067_v37  ;;  %vm2074_vm1 = vweird.f32 %v2466_v24  ;;  %v2095_v16 = vmul.f32 %v2094_v61, %v4147_v9 }
 0x24f   : > { %v2042_v11 = vmul.f32 %v2041_v21, %v2017_v31  ;;  %vm2075_vm3 = vmor %vm2073_vm2, %vm2074_vm1  ;;  %v2119_v20 = vand.u32 2147483648, %v2107_v6  ;;  %v2117_v51 = vand.u32 2147483647, %v2107_v6  ;;  %v1383_v38 = vmul.f32 0.5, %v4095_v57 }
 0x250   : > { %v2070_v60 = vsub.f32 1.0, %v2069_v56  ;;  %v2096_v32 = vadd.f32 1.1283791, %v2095_v16  ;;  %vm2113_vm7 = vweird.f32 %v2107_v6  ;;  %v1384_v39 = vmul.f32 0.5, %v4114_v27 }
 0x251   : > { %v2357_v28 = vclamps-f32 %v2042_v11, 1.0  ;;  %v2120_v48 = vor.u32 1.1754944e-38, %v2119_v20  ;;  %vm2118_vm9 = vcmp.eq.f32.partialorder %v2117_v51, 8.507059e+37 }
 0x252   : > { %v2071_v5 = vmul.f32 %v2466_v24, %v2070_v60  ;;  %v2097_v22 = vmul.f32 %v2096_v32, %v4127_v34 }
 0x253   : > { %v2180_v29 = vadd.f32 1.0, %v2357_v28  ;;  %v2468_v45 = vpop.eup %2467 }
 0x254   : > { %v2072_v63 = vadd.f32 %v2466_v24, %v2071_v5  ;;  %v2109_v15 = vmul.f32 %v2468_v45, %v2107_v6  ;;  %vm2114_vm6 = vweird.f32 %v2468_v45 }
 0x255   : > { %v2199_v12 = vmul.f32 %v2180_v29, %v1382_v25  ;;  %vm2115_vm8 = vmor %vm2113_vm7, %vm2114_vm6 }
 0x256   : > { %v2076_v52 = vsel %vm2075_vm3, %v2466_v24, %v2072_v63  ;;  %v2110_v55 = vsub.f32 1.0, %v2109_v15 }
 0x257   : > { %2218 = vst.msk [vmem:[%s3625_s10 + $0x78] sm:$0xff] %vm255_vm0, %v2199_v12  ;;  %v2081_v19 = vsel %vm2078_vm4, %v2080_v58, %v2076_v52 }
 0x258   : > { %v2082_v59 = vmul.f32 %v2081_v19, %v2057_v43  ;;  %v2111_v30 = vmul.f32 %v2468_v45, %v2110_v55 }
 0x25a   : > { %v2358_v50 = vclamps-f32 %v2082_v59, 1.0  ;;  %v2112_v35 = vadd.f32 %v2468_v45, %v2111_v30 }
 0x25c   : > { %v2181_v9 = vadd.f32 1.0, %v2358_v50  ;;  %v2116_v7 = vsel %vm2115_vm8, %v2468_v45, %v2112_v35 }
 0x25d   : > { %v2121_v46 = vsel %vm2118_vm9, %v2120_v48, %v2116_v7 }
 0x25e   : > { %v2200_v4 = vmul.f32 %v2181_v9, %v1383_v38  ;;  %v2122_v33 = vmul.f32 %v2121_v46, %v2097_v22 }
 0x260   : > { %2219 = vst.msk [vmem:[%s3625_s10 + $0x80] sm:$0xff] %vm255_vm0, %v2200_v4  ;;  %v2359_v37 = vclamps-f32 %v2122_v33, 1.0 }
 0x262   : > { %v2182_v62 = vadd.f32 1.0, %v2359_v37 }
 0x264   : > { %v2201_v57 = vmul.f32 %v2182_v62, %v1384_v39 }
 0x266   : > { %2220 = vst.msk [vmem:[%s3625_s10 + $0x88] sm:$0xff] %vm255_vm0, %v2201_v57 }
 0x267 PF: > { %s15_s18 = sadd.s32 1, %s2477_s18  }
 0x268   : > { %p12_p4 = scmp.ge.s32.totalorder %s15_s18, 4  }
 0x26a   :  { %14 = sbr.rel (!%p12_p4) target bundleno = 1 (0x1), region = 70 }

</bundles_post_ra>
